<compile_context>
chip_gen: v7x
topology: tpu7x:2x2x1
jax: 0.10.0
libtpu: 0.0.40
codegen_flags: <defaults>
</compile_context>

<pallas_src>
import functools

import jax
import jax.numpy as jnp
from jax.experimental import pallas as pl
from jax.experimental.pallas import tpu as pltpu

BN_EPS = 1e-5
LANE_ROUND = 256   # full MXU width on v6e/v7x; multiple of 128 so also fine on v5e
ROW_PAD = 16       # bf16 sublane group (covers f32's 8 as well)


# ------------------------------ small helpers ------------------------------ #

def _round_up(n, m):
    return ((n + m - 1) // m) * m


def _pad_axis(a, axis, target):
    pad = target - a.shape[axis]
    if pad <= 0:
        return a
    widths = [(0, 0)] * a.ndim
    widths[axis] = (0, pad)
    return jnp.pad(a, widths)


def _full_spec(shape):
    # whole-array block, empty grid -> everything resident in VMEM
    return pl.BlockSpec(shape, lambda: (0,) * len(shape))


def _vmem_limit_bytes():
    # Per-generation scoped-VMEM budget with headroom: ~48 MiB on v7x (64 MiB VMEM),
    # capped at 96 MiB on v5e/v6e (128 MiB VMEM).
    try:
        cap = int(pltpu.get_tpu_info().vmem_capacity_bytes)
    except Exception:
        cap = 64 * 1024 * 1024
    return min((cap * 3) // 4, 96 * 1024 * 1024)


# ------------------------------ Pallas kernels ------------------------------ #

def _mlp_block(a_f32, w1, gamma, beta, w2, b2, row_mask, inv_b):
    # Linear(no bias) -> BatchNorm1d (training-mode batch stats over the TRUE batch,
    # eps=1e-5) -> ReLU -> Linear(+bias).  MXU in bf16, BN/ReLU/bias math in f32.
    hpre = jnp.dot(a_f32.astype(jnp.bfloat16), w1,
                   preferred_element_type=jnp.float32)                    # (Bp, H) f32
    # batch statistics over true rows only (padded rows masked out), centered form
    mean = jnp.sum(hpre * row_mask, axis=0, keepdims=True) * inv_b        # (1, H)
    centered = hpre - mean
    var = jnp.sum((centered * centered) * row_mask, axis=0, keepdims=True) * inv_b
    h_norm = centered * jax.lax.rsqrt(var + BN_EPS)
    h_norm = h_norm * gamma + beta
    h_relu = jnp.maximum(h_norm, 0.0)
    return jnp.dot(h_relu.astype(jnp.bfloat16), w2,
                   preferred_element_type=jnp.float32) + b2               # (Bp, N) f32


def _row_mask(b_pad, true_b):
    rows = jax.lax.broadcasted_iota(jnp.int32, (b_pad, 1), 0)
    return (rows < true_b).astype(jnp.float32)


def _siamese_kernel_byol(x_ref, enc_w_ref,
                         pw1_ref, pg_ref, pb_ref, pw2_ref, pb2_ref,
                         qw1_ref, qg_ref, qb_ref, qw2_ref, qb2_ref,
                         y_ref, z_ref, h_ref, *, true_b):
    b_pad = x_ref.shape[0]
    inv_b = 1.0 / true_b
    mask = _row_mask(b_pad, true_b)

    # encoder(x)[0]: toy encoder = flatten (done in wrapper) + Linear (bf16 MXU)
    y = jnp.dot(x_ref[...], enc_w_ref[...], preferred_element_type=jnp.float32)
    y_ref[...] = y.astype(y_ref.dtype)

    # projector MLP
    z = _mlp_block(y, pw1_ref[...], pg_ref[...], pb_ref[...],
                   pw2_ref[...], pb2_ref[...], mask, inv_b)
    z_ref[...] = z.astype(z_ref.dtype)

    # predictor MLP (padded rows of z are non-zero -> mask keeps BN stats exact)
    h = _mlp_block(z, qw1_ref[...], qg_ref[...], qb_ref[...],
                   qw2_ref[...], qb2_ref[...], mask, inv_b)
    h_ref[...] = h.astype(h_ref.dtype)


def _siamese_kernel_simclr(x_ref, enc_w_ref,
                           pw1_ref, pg_ref, pb_ref, pw2_ref, pb2_ref,
                           z_ref, *, true_b):
    b_pad = x_ref.shape[0]
    inv_b = 1.0 / true_b
    mask = _row_mask(b_pad, true_b)

    y = jnp.dot(x_ref[...], enc_w_ref[...], preferred_element_type=jnp.float32)
    z = _mlp_block(y, pw1_ref[...], pg_ref[...], pb_ref[...],
                   pw2_ref[...], pb2_ref[...], mask, inv_b)
    z_ref[...] = z.astype(z_ref.dtype)


# ------------------------------ parameters --------------------------------- #

def init_params(key, in_features, encoder_out_dim, projector_hidden_dim, projector_out_dim):
    ks = jax.random.split(key, 5)
    scale = 0.02
    return {
        # toy encoder: flatten + Linear (stands in for the injected `encoder`)
        # TODO(synk): the PyTorch module takes an arbitrary encoder nn.Module; only a
        # flatten+Linear stand-in is implemented here.
        "enc_w": scale * jax.random.normal(ks[0], (in_features, encoder_out_dim), jnp.float32),
        # projector mlp
        "proj_w1": scale * jax.random.normal(ks[1], (encoder_out_dim, projector_hidden_dim), jnp.float32),
        "proj_gamma": jnp.ones((1, projector_hidden_dim), jnp.float32),
        "proj_beta": jnp.zeros((1, projector_hidden_dim), jnp.float32),
        "proj_w2": scale * jax.random.normal(ks[2], (projector_hidden_dim, projector_out_dim), jnp.float32),
        "proj_b2": jnp.zeros((1, projector_out_dim), jnp.float32),
        # predictor mlp
        "pred_w1": scale * jax.random.normal(ks[3], (projector_out_dim, projector_hidden_dim), jnp.float32),
        "pred_gamma": jnp.ones((1, projector_hidden_dim), jnp.float32),
        "pred_beta": jnp.zeros((1, projector_hidden_dim), jnp.float32),
        "pred_w2": scale * jax.random.normal(ks[4], (projector_hidden_dim, projector_out_dim), jnp.float32),
        "pred_b2": jnp.zeros((1, projector_out_dim), jnp.float32),
    }


def prepare_params(params):
    """Zero-pad every feature dim up to a multiple of 256 (full MXU width on v6e/v7x,
    lane-dense everywhere) and cast matmul weights to bf16.  Zero padding keeps the
    math exact (padded gamma/beta/bias stay ZERO so padded columns stay zero); padded
    output columns are sliced away in the wrapper."""
    Kp = _round_up(params["enc_w"].shape[0], LANE_ROUND)
    Ep = _round_up(params["enc_w"].shape[1], LANE_ROUND)
    Hp = _round_up(params["proj_w1"].shape[1], LANE_ROUND)
    Op = _round_up(params["proj_w2"].shape[1], LANE_ROUND)

    def pad2(w, r, c):
        return _pad_axis(_pad_axis(w, 0, r), 1, c)

    kparams = {
        "enc_w": pad2(params["enc_w"], Kp, Ep).astype(jnp.bfloat16),
        "proj_w1": pad2(params["proj_w1"], Ep, Hp).astype(jnp.bfloat16),
        "proj_gamma": _pad_axis(params["proj_gamma"], 1, Hp).astype(jnp.float32),
        "proj_beta": _pad_axis(params["proj_beta"], 1, Hp).astype(jnp.float32),
        "proj_w2": pad2(params["proj_w2"], Hp, Op).astype(jnp.bfloat16),
        "proj_b2": _pad_axis(params["proj_b2"], 1, Op).astype(jnp.float32),
        "pred_w1": pad2(params["pred_w1"], Op, Hp).astype(jnp.bfloat16),
        "pred_gamma": _pad_axis(params["pred_gamma"], 1, Hp).astype(jnp.float32),
        "pred_beta": _pad_axis(params["pred_beta"], 1, Hp).astype(jnp.float32),
        "pred_w2": pad2(params["pred_w2"], Hp, Op).astype(jnp.bfloat16),
        "pred_b2": _pad_axis(params["pred_b2"], 1, Op).astype(jnp.float32),
    }
    dims = (params["enc_w"].shape[1], params["proj_w2"].shape[1])  # (enc_out, proj_out), static
    return kparams, dims


# ------------------------------ forward pass -------------------------------- #

@functools.partial(jax.jit, static_argnames=("dims", "ssl_method"))
def siamese_arm_forward(kparams, x, dims, ssl_method="byol"):
    if ssl_method not in ("simclr", "byol"):
        raise ValueError(f"unknown ssl_method: {ssl_method!r}")
    enc_out, proj_out = dims

    B = x.shape[0]
    B_pad = max(_round_up(B, ROW_PAD), ROW_PAD)

    Kp = kparams["enc_w"].shape[0]
    Ep = kparams["enc_w"].shape[1]
    Hp = kparams["proj_w1"].shape[1]
    Op = kparams["proj_w2"].shape[1]

    # Flatten + single cast straight to bf16.  Lane pad is a no-op when in_features is
    # already 256-aligned (it is here); only the small row pad to a full sublane group
    # remains (in production, pad the batch at data-prep time instead).
    x_flat = x.reshape(B, -1).astype(jnp.bfloat16)
    x_p = _pad_axis(_pad_axis(x_flat, 1, Kp), 0, B_pad)

    cparams = pltpu.CompilerParams(vmem_limit_bytes=_vmem_limit_bytes())

    proj_args = (
        kparams["proj_w1"], kparams["proj_gamma"], kparams["proj_beta"],
        kparams["proj_w2"], kparams["proj_b2"],
    )
    pred_args = (
        kparams["pred_w1"], kparams["pred_gamma"], kparams["pred_beta"],
        kparams["pred_w2"], kparams["pred_b2"],
    )

    if ssl_method == "simclr":
        # simclr variant: skip the predictor entirely and write only z.
        args = (x_p, kparams["enc_w"]) + proj_args
        in_specs = [_full_spec(a.shape) for a in args]
        out_shape = jax.ShapeDtypeStruct((B_pad, Op), jnp.bfloat16)
        out_specs = _full_spec((B_pad, Op))

        flops = 2 * B_pad * (Kp * Ep + Ep * Hp + Hp * Op)
        bytes_in = sum(int(a.size) * a.dtype.itemsize for a in args)
        bytes_out = 2 * B_pad * Op
        cost = pl.CostEstimate(flops=int(flops), transcendentals=int(Hp),
                               bytes_accessed=int(bytes_in + bytes_out))

        z_p = pl.pallas_call(
            functools.partial(_siamese_kernel_simclr, true_b=B),
            out_shape=out_shape,
            in_specs=in_specs,
            out_specs=out_specs,
            cost_estimate=cost,
            compiler_params=cparams,
        )(*args)
        return z_p[:B, :proj_out].astype(jnp.float32)

    # byol -> (y, z, h)
    args = (x_p, kparams["enc_w"]) + proj_args + pred_args
    in_specs = [_full_spec(a.shape) for a in args]
    out_shape = (
        jax.ShapeDtypeStruct((B_pad, Ep), jnp.bfloat16),   # y (padded, bf16 writeback)
        jax.ShapeDtypeStruct((B_pad, Op), jnp.bfloat16),   # z
        jax.ShapeDtypeStruct((B_pad, Op), jnp.bfloat16),   # h
    )
    out_specs = (_full_spec((B_pad, Ep)), _full_spec((B_pad, Op)), _full_spec((B_pad, Op)))

    flops = 2 * B_pad * (Kp * Ep + Ep * Hp + Hp * Op + Op * Hp + Hp * Op)
    bytes_in = sum(int(a.size) * a.dtype.itemsize for a in args)
    bytes_out = 2 * B_pad * (Ep + 2 * Op)
    cost = pl.CostEstimate(flops=int(flops), transcendentals=int(2 * Hp),
                           bytes_accessed=int(bytes_in + bytes_out))

    y_p, z_p, h_p = pl.pallas_call(
        functools.partial(_siamese_kernel_byol, true_b=B),
        out_shape=out_shape,
        in_specs=in_specs,
        out_specs=out_specs,
        cost_estimate=cost,
        compiler_params=cparams,
    )(*args)

    y = y_p[:B, :enc_out].astype(jnp.float32)
    z = z_p[:B, :proj_out].astype(jnp.float32)
    h = h_p[:B, :proj_out].astype(jnp.float32)
    return (y, z, h)


# ---------------------------- reference (plain JAX) ------------------------- #
# Matches the kernel's numerics (bf16 MXU inputs, f32 accumulation & BN math).

def _ref_mlp(a, w1, gamma, beta, w2, b2):
    hh = jnp.dot(a.astype(jnp.bfloat16), w1.astype(jnp.bfloat16),
                 preferred_element_type=jnp.float32)
    mean = hh.mean(axis=0, keepdims=True)
    var = ((hh - mean) ** 2).mean(axis=0, keepdims=True)
    hn = (hh - mean) / jnp.sqrt(var + BN_EPS) * gamma + beta
    hr = jnp.maximum(hn, 0.0)
    return jnp.dot(hr.astype(jnp.bfloat16), w2.astype(jnp.bfloat16),
                   preferred_element_type=jnp.float32) + b2


def _ref_forward(params, x):
    B = x.shape[0]
    x_flat = x.reshape(B, -1).astype(jnp.float32)
    y = jnp.dot(x_flat.astype(jnp.bfloat16), params["enc_w"].astype(jnp.bfloat16),
                preferred_element_type=jnp.float32)
    z = _ref_mlp(y, params["proj_w1"], params["proj_gamma"], params["proj_beta"],
                 params["proj_w2"], params["proj_b2"])
    h = _ref_mlp(z, params["pred_w1"], params["pred_gamma"], params["pred_beta"],
                 params["pred_w2"], params["pred_b2"])
    return (y, z, h)


# --------------------------------- main ------------------------------------- #

if __name__ == "__main__":
    # Small shapes consistent with the module (scaled-down enc/hidden/out dims).
    B, C, H, W = 2, 4, 16, 16
    encoder_out_dim, projector_hidden_dim, projector_out_dim = 32, 64, 16

    key = jax.random.PRNGKey(0)
    k_x, k_p = jax.random.split(key)
    x = jax.random.normal(k_x, (B, C, H, W), jnp.float32)
    params = init_params(k_p, C * H * W, encoder_out_dim,
                         projector_hidden_dim, projector_out_dim)
    kparams, dims = prepare_params(params)

    # byol -> (y, z, h)
    y, z, h = siamese_arm_forward(kparams, x, dims=dims, ssl_method="byol")
    jax.block_until_ready((y, z, h))

    assert y.shape == (B, encoder_out_dim)
    assert z.shape == (B, projector_out_dim)
    assert h.shape == (B, projector_out_dim)

    yr, zr, hr = _ref_forward(params, x)
    assert jnp.allclose(y, yr, atol=1e-2, rtol=1e-2), "encoder output mismatch"
    assert jnp.allclose(z, zr, atol=1e-2, rtol=1e-2), "projector output mismatch"
    assert jnp.allclose(h, hr, atol=1e-2, rtol=1e-2), "predictor output mismatch"

    # simclr -> z only (dedicated kernel variant: no predictor, no y/h writeback)
    z_only = siamese_arm_forward(kparams, x, dims=dims, ssl_method="simclr")
    jax.block_until_ready(z_only)
    assert z_only.shape == (B, projector_out_dim)
    assert jnp.allclose(z_only, zr, atol=1e-2, rtol=1e-2), "simclr output mismatch"

    print("KERNEL_OK")
</pallas_src>

<mosaic_0001>
module attributes {stable_mosaic.version = 11 : i64} {
  func.func @_siamese_kernel_byol(%arg0: memref<16x1024xbf16, #tpu.memory_space<vmem>>, %arg1: memref<1024x256xbf16, #tpu.memory_space<vmem>>, %arg2: memref<256x256xbf16, #tpu.memory_space<vmem>>, %arg3: memref<1x256xf32, #tpu.memory_space<vmem>>, %arg4: memref<1x256xf32, #tpu.memory_space<vmem>>, %arg5: memref<256x256xbf16, #tpu.memory_space<vmem>>, %arg6: memref<1x256xf32, #tpu.memory_space<vmem>>, %arg7: memref<256x256xbf16, #tpu.memory_space<vmem>>, %arg8: memref<1x256xf32, #tpu.memory_space<vmem>>, %arg9: memref<1x256xf32, #tpu.memory_space<vmem>>, %arg10: memref<256x256xbf16, #tpu.memory_space<vmem>>, %arg11: memref<1x256xf32, #tpu.memory_space<vmem>>, %arg12: memref<16x256xbf16, #tpu.memory_space<vmem>>, %arg13: memref<16x256xbf16, #tpu.memory_space<vmem>>, %arg14: memref<16x256xbf16, #tpu.memory_space<vmem>>) attributes {dimension_semantics = [], scalar_prefetch = 0 : i64, scratch_operands = 0 : i64, tpu.core_type = #tpu.core_type<tc>} {
    %0 = tpu.iota {dimensions = array<i32: 0>} : vector<16x1xi32>
    %c2_i32 = arith.constant 2 : i32
    %1 = vector.broadcast %c2_i32 : i32 to vector<16x1xi32>
    %2 = arith.cmpi slt, %0, %1 : vector<16x1xi32>
    %3 = arith.extui %2 : vector<16x1xi1> to vector<16x1xi32>
    %4 = arith.sitofp %3 : vector<16x1xi32> to vector<16x1xf32>
    %c0 = arith.constant 0 : index
    %c0_0 = arith.constant 0 : index
    %5 = vector.load %arg0[%c0, %c0_0] : memref<16x1024xbf16, #tpu.memory_space<vmem>>, vector<16x1024xbf16>
    %c0_1 = arith.constant 0 : index
    %c0_2 = arith.constant 0 : index
    %6 = vector.load %arg1[%c0_1, %c0_2] : memref<1024x256xbf16, #tpu.memory_space<vmem>>, vector<1024x256xbf16>
    %cst = arith.constant dense<0.000000e+00> : vector<16x256xf32>
    %7 = tpu.matmul %5, %6, %cst {dimension_numbers = #tpu.dot_dimension_numbers<[1], [0], [0], [1], [0, 0, 1, 1], [], []>} : vector<16x1024xbf16>, vector<1024x256xbf16>, vector<16x256xf32> -> vector<16x256xf32>
    %8 = arith.truncf %7 : vector<16x256xf32> to vector<16x256xbf16>
    %c0_3 = arith.constant 0 : index
    %c0_4 = arith.constant 0 : index
    %9 = vector.load %arg12[%c0_3, %c0_4] : memref<16x256xbf16, #tpu.memory_space<vmem>>, vector<16x256xbf16>
    tpu.vector_store %arg12[%c0_3, %c0_4], %8 {strides = array<i32>} : memref<16x256xbf16, #tpu.memory_space<vmem>>, vector<16x256xbf16>,
    %c0_5 = arith.constant 0 : index
    %c0_6 = arith.constant 0 : index
    %10 = vector.load %arg2[%c0_5, %c0_6] : memref<256x256xbf16, #tpu.memory_space<vmem>>, vector<256x256xbf16>
    %c0_7 = arith.constant 0 : index
    %c0_8 = arith.constant 0 : index
    %11 = vector.load %arg3[%c0_7, %c0_8] : memref<1x256xf32, #tpu.memory_space<vmem>>, vector<1x256xf32>
    %c0_9 = arith.constant 0 : index
    %c0_10 = arith.constant 0 : index
    %12 = vector.load %arg4[%c0_9, %c0_10] : memref<1x256xf32, #tpu.memory_space<vmem>>, vector<1x256xf32>
    %c0_11 = arith.constant 0 : index
    %c0_12 = arith.constant 0 : index
    %13 = vector.load %arg5[%c0_11, %c0_12] : memref<256x256xbf16, #tpu.memory_space<vmem>>, vector<256x256xbf16>
    %c0_13 = arith.constant 0 : index
    %c0_14 = arith.constant 0 : index
    %14 = vector.load %arg6[%c0_13, %c0_14] : memref<1x256xf32, #tpu.memory_space<vmem>>, vector<1x256xf32>
    %15 = arith.truncf %7 : vector<16x256xf32> to vector<16x256xbf16>
    %cst_15 = arith.constant dense<0.000000e+00> : vector<16x256xf32>
    %16 = tpu.matmul %15, %10, %cst_15 {dimension_numbers = #tpu.dot_dimension_numbers<[1], [0], [0], [1], [0, 0, 1, 1], [], []>} : vector<16x256xbf16>, vector<256x256xbf16>, vector<16x256xf32> -> vector<16x256xf32>
    %17 = vector.broadcast %4 : vector<16x1xf32> to vector<16x256xf32>
    %18 = arith.mulf %16, %17 : vector<16x256xf32>
    %cst_16 = arith.constant dense<0.000000e+00> : vector<256xf32>
    %19 = vector.multi_reduction <add>, %18, %cst_16 [0] : vector<16x256xf32> to vector<256xf32>
    %20 = vector.shape_cast %19 : vector<256xf32> to vector<1x256xf32>
    %cst_17 = arith.constant 5.000000e-01 : f32
    %21 = vector.broadcast %cst_17 : f32 to vector<1x256xf32>
    %22 = arith.mulf %20, %21 : vector<1x256xf32>
    %23 = vector.broadcast %22 : vector<1x256xf32> to vector<16x256xf32>
    %24 = arith.subf %16, %23 : vector<16x256xf32>
    %25 = arith.mulf %24, %24 : vector<16x256xf32>
    %26 = vector.broadcast %4 : vector<16x1xf32> to vector<16x256xf32>
    %27 = arith.mulf %25, %26 : vector<16x256xf32>
    %cst_18 = arith.constant dense<0.000000e+00> : vector<256xf32>
    %28 = vector.multi_reduction <add>, %27, %cst_18 [0] : vector<16x256xf32> to vector<256xf32>
    %29 = vector.shape_cast %28 : vector<256xf32> to vector<1x256xf32>
    %cst_19 = arith.constant 5.000000e-01 : f32
    %30 = vector.broadcast %cst_19 : f32 to vector<1x256xf32>
    %31 = arith.mulf %29, %30 : vector<1x256xf32>
    %cst_20 = arith.constant 9.99999974E-6 : f32
    %32 = vector.broadcast %cst_20 : f32 to vector<1x256xf32>
    %33 = arith.addf %31, %32 : vector<1x256xf32>
    %34 = math.rsqrt %33 : vector<1x256xf32>
    %35 = vector.broadcast %34 : vector<1x256xf32> to vector<16x256xf32>
    %36 = arith.mulf %24, %35 : vector<16x256xf32>
    %37 = vector.broadcast %11 : vector<1x256xf32> to vector<16x256xf32>
    %38 = arith.mulf %36, %37 : vector<16x256xf32>
    %39 = vector.broadcast %12 : vector<1x256xf32> to vector<16x256xf32>
    %40 = arith.addf %38, %39 : vector<16x256xf32>
    %cst_21 = arith.constant 0.000000e+00 : f32
    %41 = vector.broadcast %cst_21 : f32 to vector<16x256xf32>
    %42 = arith.maximumf %40, %41 : vector<16x256xf32>
    %43 = arith.truncf %42 : vector<16x256xf32> to vector<16x256xbf16>
    %cst_22 = arith.constant dense<0.000000e+00> : vector<16x256xf32>
    %44 = tpu.matmul %43, %13, %cst_22 {dimension_numbers = #tpu.dot_dimension_numbers<[1], [0], [0], [1], [0, 0, 1, 1], [], []>} : vector<16x256xbf16>, vector<256x256xbf16>, vector<16x256xf32> -> vector<16x256xf32>
    %45 = vector.broadcast %14 : vector<1x256xf32> to vector<16x256xf32>
    %46 = arith.addf %44, %45 : vector<16x256xf32>
    %47 = arith.truncf %46 : vector<16x256xf32> to vector<16x256xbf16>
    %c0_23 = arith.constant 0 : index
    %c0_24 = arith.constant 0 : index
    %48 = vector.load %arg13[%c0_23, %c0_24] : memref<16x256xbf16, #tpu.memory_space<vmem>>, vector<16x256xbf16>
    tpu.vector_store %arg13[%c0_23, %c0_24], %47 {strides = array<i32>} : memref<16x256xbf16, #tpu.memory_space<vmem>>, vector<16x256xbf16>,
    %c0_25 = arith.constant 0 : index
    %c0_26 = arith.constant 0 : index
    %49 = vector.load %arg7[%c0_25, %c0_26] : memref<256x256xbf16, #tpu.memory_space<vmem>>, vector<256x256xbf16>
    %c0_27 = arith.constant 0 : index
    %c0_28 = arith.constant 0 : index
    %50 = vector.load %arg8[%c0_27, %c0_28] : memref<1x256xf32, #tpu.memory_space<vmem>>, vector<1x256xf32>
    %c0_29 = arith.constant 0 : index
    %c0_30 = arith.constant 0 : index
    %51 = vector.load %arg9[%c0_29, %c0_30] : memref<1x256xf32, #tpu.memory_space<vmem>>, vector<1x256xf32>
    %c0_31 = arith.constant 0 : index
    %c0_32 = arith.constant 0 : index
    %52 = vector.load %arg10[%c0_31, %c0_32] : memref<256x256xbf16, #tpu.memory_space<vmem>>, vector<256x256xbf16>
    %c0_33 = arith.constant 0 : index
    %c0_34 = arith.constant 0 : index
    %53 = vector.load %arg11[%c0_33, %c0_34] : memref<1x256xf32, #tpu.memory_space<vmem>>, vector<1x256xf32>
    %54 = arith.truncf %46 : vector<16x256xf32> to vector<16x256xbf16>
    %cst_35 = arith.constant dense<0.000000e+00> : vector<16x256xf32>
    %55 = tpu.matmul %54, %49, %cst_35 {dimension_numbers = #tpu.dot_dimension_numbers<[1], [0], [0], [1], [0, 0, 1, 1], [], []>} : vector<16x256xbf16>, vector<256x256xbf16>, vector<16x256xf32> -> vector<16x256xf32>
    %56 = vector.broadcast %4 : vector<16x1xf32> to vector<16x256xf32>
    %57 = arith.mulf %55, %56 : vector<16x256xf32>
    %cst_36 = arith.constant dense<0.000000e+00> : vector<256xf32>
    %58 = vector.multi_reduction <add>, %57, %cst_36 [0] : vector<16x256xf32> to vector<256xf32>
    %59 = vector.shape_cast %58 : vector<256xf32> to vector<1x256xf32>
    %cst_37 = arith.constant 5.000000e-01 : f32
    %60 = vector.broadcast %cst_37 : f32 to vector<1x256xf32>
    %61 = arith.mulf %59, %60 : vector<1x256xf32>
    %62 = vector.broadcast %61 : vector<1x256xf32> to vector<16x256xf32>
    %63 = arith.subf %55, %62 : vector<16x256xf32>
    %64 = arith.mulf %63, %63 : vector<16x256xf32>
    %65 = vector.broadcast %4 : vector<16x1xf32> to vector<16x256xf32>
    %66 = arith.mulf %64, %65 : vector<16x256xf32>
    %cst_38 = arith.constant dense<0.000000e+00> : vector<256xf32>
    %67 = vector.multi_reduction <add>, %66, %cst_38 [0] : vector<16x256xf32> to vector<256xf32>
    %68 = vector.shape_cast %67 : vector<256xf32> to vector<1x256xf32>
    %cst_39 = arith.constant 5.000000e-01 : f32
    %69 = vector.broadcast %cst_39 : f32 to vector<1x256xf32>
    %70 = arith.mulf %68, %69 : vector<1x256xf32>
    %cst_40 = arith.constant 9.99999974E-6 : f32
    %71 = vector.broadcast %cst_40 : f32 to vector<1x256xf32>
    %72 = arith.addf %70, %71 : vector<1x256xf32>
    %73 = math.rsqrt %72 : vector<1x256xf32>
    %74 = vector.broadcast %73 : vector<1x256xf32> to vector<16x256xf32>
    %75 = arith.mulf %63, %74 : vector<16x256xf32>
    %76 = vector.broadcast %50 : vector<1x256xf32> to vector<16x256xf32>
    %77 = arith.mulf %75, %76 : vector<16x256xf32>
    %78 = vector.broadcast %51 : vector<1x256xf32> to vector<16x256xf32>
    %79 = arith.addf %77, %78 : vector<16x256xf32>
    %cst_41 = arith.constant 0.000000e+00 : f32
    %80 = vector.broadcast %cst_41 : f32 to vector<16x256xf32>
    %81 = arith.maximumf %79, %80 : vector<16x256xf32>
    %82 = arith.truncf %81 : vector<16x256xf32> to vector<16x256xbf16>
    %cst_42 = arith.constant dense<0.000000e+00> : vector<16x256xf32>
    %83 = tpu.matmul %82, %52, %cst_42 {dimension_numbers = #tpu.dot_dimension_numbers<[1], [0], [0], [1], [0, 0, 1, 1], [], []>} : vector<16x256xbf16>, vector<256x256xbf16>, vector<16x256xf32> -> vector<16x256xf32>
    %84 = vector.broadcast %53 : vector<1x256xf32> to vector<16x256xf32>
    %85 = arith.addf %83, %84 : vector<16x256xf32>
    %86 = arith.truncf %85 : vector<16x256xf32> to vector<16x256xbf16>
    %c0_43 = arith.constant 0 : index
    %c0_44 = arith.constant 0 : index
    %87 = vector.load %arg14[%c0_43, %c0_44] : memref<16x256xbf16, #tpu.memory_space<vmem>>, vector<16x256xbf16>
    tpu.vector_store %arg14[%c0_43, %c0_44], %86 {strides = array<i32>} : memref<16x256xbf16, #tpu.memory_space<vmem>>, vector<16x256xbf16>,
    return
  }
}

</mosaic_0001>

<bundles_post_ra>
// kernel: siamese_arm_forward.1
= control target key start
LH: loop header
LB: loop body
LE: loop exit
PB: predicated region body
PF: predicated region fallthrough
CT: control target
= control target key end

     0   :  { %20 = vsyncpa [#allocation3], 0  ;;  %s3449_s0 = inlined_call_operand.vmem [shape: bf16[16,1024], index: 0, kind: input, shape index: {}]   ;;  %s3450_s1 = inlined_call_operand.hbm [shape: bf16[1024,256], index: 1, kind: input, shape index: {}]   ;;  %s3451_s2 = inlined_call_operand.vmem [shape: bf16[256,256], index: 2, kind: input, shape index: {}]   ;;  %s3452_s3 = inlined_call_operand.vmem [shape: f32[1,256], index: 3, kind: input, shape index: {}]   ;;  %s3453_s4 = inlined_call_operand.vmem [shape: f32[1,256], index: 4, kind: input, shape index: {}]   ;;  %s3454_s5 = inlined_call_operand.hbm [shape: bf16[256,256], index: 5, kind: input, shape index: {}]   ;;  %s3455_s6 = inlined_call_operand.vmem [shape: f32[1,256], index: 6, kind: input, shape index: {}]   ;;  %s3456_s7 = inlined_call_operand.hbm [shape: bf16[256,256], index: 7, kind: input, shape index: {}]   ;;  %s3457_s8 = inlined_call_operand.vmem [shape: f32[1,256], index: 8, kind: input, shape index: {}]   ;;  %s3458_s9 = inlined_call_operand.vmem [shape: f32[1,256], index: 9, kind: input, shape index: {}]   ;;  %s3459_s10 = inlined_call_operand.hbm [shape: bf16[256,256], index: 10, kind: input, shape index: {}]   ;;  %s3460_s11 = inlined_call_operand.vmem [shape: f32[1,256], index: 11, kind: input, shape index: {}]   ;;  %s3461_s12 = inlined_call_operand.vmem [shape: bf16[16,256], index: 12, kind: output, shape index: {0}]   ;;  %s3462_s13 = inlined_call_operand.vmem [shape: bf16[16,256], index: 13, kind: output, shape index: {1}]   ;;  %s3463_s14 = inlined_call_operand.vmem [shape: bf16[16,256], index: 14, kind: output, shape index: {2}]  }
   0x1   :  { %21 = vsyncpa [#allocation5], 0 }
   0x2   :  { %22 = vsyncpa [#allocation8], 0  ;;  %s3087_s29 = smov [#allocation4]   ;;  %s3088_s15 = smov [#allocation2]  }
   0x3   :  { %s48_s30 = sshll.u32 %s3087_s29, 4  ;;  %s30_s16 = sshll.u32 %s3088_s15, 4  ;;  %s49_s30 = int_to_ptr.vmem [resolvable:$true] %s48_s30  ;;  %s3169_s16 = int_to_ptr.vmem [resolvable:$true] %s30_s16 }
   0x4   :  { %s2993_s19 = scalar_lea.hbm %s3454_s5, 4096 }
   0x5   :  { %p2994_p0 = scmp.ne.s32.totalorder %s3454_s5, %s2993_s19  ;;  %p2997_p1 = scmp.lt.u32.totalorder %s2993_s19, %s3454_s5 }
   0x7   :  { %p2999_p2 = pnand %p2997_p1, %p2994_p0 }
   0x9   :  { %3002 = shalt.err (!%p2999_p2)
}
   0xa   :  { %s3003_s24 = scalar_lea.vmem %s49_s30, 4096  ;;  %p3008_p4 = scmp.lt.s32.totalorder %s49_s30, %s49_s30 }
   0xb   :  { %p3004_p3 = scmp.ne.s32.totalorder %s49_s30, %s3003_s24  ;;  %p3009_p5 = scmp.lt.s32.totalorder %s3003_s24, %s3003_s24 }
   0xd   :  { %p3010_p6 = por %p3009_p5, %p3008_p4 }
   0xf   :  { %p3011_p7 = pnand %p3010_p6, %p3004_p3 }
  0x11   :  { %3014 = shalt.err (!%p3011_p7)
}
  0x12   :  { %s3089_s25 = smov 128   ;;  %s3090_s26 = smov 8  }
  0x13   :  { %54 = dma.hbm_to_vmem [thread:$0]  %s3454_s5, 4096, %s49_s30, [#allocation5], %s3089_s25, %s3089_s25, %s3090_s26  }
  0x14   :  { %s3015_s17 = scalar_lea.hbm %s3450_s1, 16384 }
  0x15   :  { %p3016_p8 = scmp.ne.s32.totalorder %s3450_s1, %s3015_s17  ;;  %p3019_p9 = scmp.lt.u32.totalorder %s3015_s17, %s3450_s1 }
  0x17   :  { %p3021_p10 = pnand %p3019_p9, %p3016_p8 }
  0x19   :  { %3024 = shalt.err (!%p3021_p10)
}
  0x1a   :  { %s3025_s22 = scalar_lea.vmem %s3169_s16, 16384  ;;  %p3030_p12 = scmp.lt.s32.totalorder %s3169_s16, %s3169_s16 }
  0x1b   :  { %p3026_p11 = scmp.ne.s32.totalorder %s3169_s16, %s3025_s22  ;;  %p3031_p13 = scmp.lt.s32.totalorder %s3025_s22, %s3025_s22 }
  0x1d   :  { %p3032_p0 = por %p3031_p13, %p3030_p12 }
  0x1f   :  { %p3033_p1 = pnand %p3032_p0, %p3026_p11 }
  0x21   :  { %3036 = shalt.err (!%p3033_p1)
}
  0x22   :  { %36 = dma.hbm_to_vmem [thread:$0]  %s3450_s1, 16384, %s3169_s16, [#allocation3], %s3089_s25, %s3089_s25, %s3090_s26  }
  0x23   :  { %s3091_s23 = smov [#allocation6]   ;;  %s3092_s27 = smov [#allocation7]  }
  0x24   :  { %s62_s24 = sshll.u32 %s3091_s23, 4  ;;  %s78_s28 = sshll.u32 %s3092_s27, 4  ;;  %s63_s24 = int_to_ptr.vmem [resolvable:$true] %s62_s24  ;;  %s3206_s28 = int_to_ptr.vmem [resolvable:$true] %s78_s28 }
  0x25   :  { %s3037_s17 = scalar_lea.hbm %s3456_s7, 4096 }
  0x26   :  { %p3038_p2 = scmp.ne.s32.totalorder %s3456_s7, %s3037_s17  ;;  %p3041_p3 = scmp.lt.u32.totalorder %s3037_s17, %s3456_s7 }
  0x28   :  { %p3043_p4 = pnand %p3041_p3, %p3038_p2 }
  0x2a   :  { %3046 = shalt.err (!%p3043_p4)
}
  0x2b   :  { %s3047_s1 = scalar_lea.vmem %s63_s24, 4096  ;;  %p3052_p6 = scmp.lt.s32.totalorder %s63_s24, %s63_s24 }
  0x2c   :  { %p3048_p5 = scmp.ne.s32.totalorder %s63_s24, %s3047_s1  ;;  %p3053_p7 = scmp.lt.s32.totalorder %s3047_s1, %s3047_s1 }
  0x2e   :  { %p3054_p8 = por %p3053_p7, %p3052_p6 }
  0x30   :  { %p3055_p9 = pnand %p3054_p8, %p3048_p5 }
  0x32   :  { %3058 = shalt.err (!%p3055_p9)
}
  0x33   :  { %68 = dma.hbm_to_vmem [thread:$0]  %s3456_s7, 4096, %s63_s24, [#allocation5], %s3089_s25, %s3089_s25, %s3090_s26  }
  0x34   :  { %s3059_s23 = scalar_lea.hbm %s3459_s10, 4096 }
  0x35   :  { %p3060_p10 = scmp.ne.s32.totalorder %s3459_s10, %s3059_s23  ;;  %p3063_p11 = scmp.lt.u32.totalorder %s3059_s23, %s3459_s10 }
  0x37   :  { %p3065_p12 = pnand %p3063_p11, %p3060_p10 }
  0x39   :  { %3068 = shalt.err (!%p3065_p12)
}
  0x3a   :  { %s3069_s18 = scalar_lea.vmem %s3206_s28, 4096  ;;  %p3074_p0 = scmp.lt.s32.totalorder %s3206_s28, %s3206_s28 }
  0x3b   :  { %p3070_p13 = scmp.ne.s32.totalorder %s3206_s28, %s3069_s18  ;;  %p3075_p1 = scmp.lt.s32.totalorder %s3069_s18, %s3069_s18 }
  0x3d   :  { %p3076_p2 = por %p3075_p1, %p3074_p0 }
  0x3f   :  { %p3077_p3 = pnand %p3076_p2, %p3070_p13 }
  0x41   :  { %3080 = shalt.err (!%p3077_p3)
}
  0x42   :  { %84 = dma.hbm_to_vmem [thread:$0]  %s3459_s10, 4096, %s3206_s28, [#allocation8], %s3089_s25, %s3089_s25, %s3090_s26  }
  0x43   :  { %3081 = dma.done.wait [#allocation3], 16384  }
  0x44   :  { %3082 = vsyncadd [#allocation3], 4294950912 }
  0x45   :  { %3083 = dma.done.wait [#allocation5], 8192  }
  0x46   :  { %3084 = vsyncadd [#allocation5], 4294959104 }
  0x47   :  { %3085 = dma.done.wait [#allocation8], 4096  }
  0x48   :  { %3086 = vsyncadd [#allocation8], 4294963200  ;;  %v2601_v0 = vld [vmem:[#allocation2 + $0x4] ss:$8 sps:$4 sm:$0xff]   ;;  %v2603_v1 = vld [vmem:[#allocation2] ss:$8 sps:$4 sm:$0xff]  }
  0x49   :  { %924 = vmatprep.subr.bf16.mxu0 %v2601_v0  ;;  %v2604_v2 = vld [vmem:[#allocation2 + $0x14] ss:$8 sps:$4 sm:$0xff]   ;;  %v2606_v3 = vld [vmem:[#allocation2 + $0x10] ss:$8 sps:$4 sm:$0xff]   ;;  %v2607_v4 = vld [vmem:[#allocation2 + $0x24] ss:$8 sps:$4 sm:$0xff]  }
  0x4a   :  { %925 = vmatpush1.bf16.msra.mxu0 %v2603_v1  ;;  %v2609_v5 = vld [vmem:[#allocation2 + $0x20] ss:$8 sps:$4 sm:$0xff]   ;;  %v2610_v6 = vld [vmem:[#allocation2 + $0x34] ss:$8 sps:$4 sm:$0xff]   ;;  %v2612_v7 = vld [vmem:[#allocation2 + $0x30] ss:$8 sps:$4 sm:$0xff]  }
  0x4b   :  { %926 = vmatprep.subr.bf16.mxu0 %v2604_v2  ;;  %v2613_v8 = vld [vmem:[#allocation2 + $0x44] ss:$8 sps:$4 sm:$0xff]   ;;  %v2615_v9 = vld [vmem:[#allocation2 + $0x40] ss:$8 sps:$4 sm:$0xff]   ;;  %v2616_v10 = vld [vmem:[#allocation2 + $0x54] ss:$8 sps:$4 sm:$0xff]  }
  0x4c   :  { %v2618_v11 = vld [vmem:[#allocation2 + $0x50] ss:$8 sps:$4 sm:$0xff]   ;;  %v2619_v12 = vld [vmem:[#allocation2 + $0x64] ss:$8 sps:$4 sm:$0xff]   ;;  %v2621_v16 = vld [vmem:[#allocation2 + $0x60] ss:$8 sps:$4 sm:$0xff]  }
  0x4d   :  { %v108_v13 = vld [vmem:[%s3449_s0] sm:$0xff]  ;;  %v2622_v17 = vld [vmem:[#allocation2 + $0x74] ss:$8 sps:$4 sm:$0xff]   ;;  %v2624_v18 = vld [vmem:[#allocation2 + $0x70] ss:$8 sps:$4 sm:$0xff]  }
  0x4e   :  { %927 = vmatpush1.bf16.msra.mxu0 %v2606_v3  ;;  %v112_v14 = vld [vmem:[%s3449_s0 + $0x20] sm:$0xff]  ;;  %v2628_v21 = vld [vmem:[#allocation2 + $0x94] ss:$8 sps:$4 sm:$0xff]   ;;  %v2630_v22 = vld [vmem:[#allocation2 + $0x90] ss:$8 sps:$4 sm:$0xff]  }
  0x4f   :  { %928 = vmatprep.subr.bf16.mxu0 %v2607_v4  ;;  %v2307_v15 = vcombine.high %v108_v13, %v112_v14  ;;  %v2625_v19 = vld [vmem:[#allocation2 + $0x84] ss:$8 sps:$4 sm:$0xff]   ;;  %v2627_v20 = vld [vmem:[#allocation2 + $0x80] ss:$8 sps:$4 sm:$0xff]   ;;  %v2634_v25 = vld [vmem:[#allocation2 + $0xb4] ss:$8 sps:$4 sm:$0xff]   ;;  %v2306_v38 = vcombine.low %v108_v13, %v112_v14 }
  0x50   :  { %v2631_v23 = vld [vmem:[#allocation2 + $0xa4] ss:$8 sps:$4 sm:$0xff]   ;;  %v2633_v24 = vld [vmem:[#allocation2 + $0xa0] ss:$8 sps:$4 sm:$0xff]   ;;  %v2636_v26 = vld [vmem:[#allocation2 + $0xb0] ss:$8 sps:$4 sm:$0xff]  }
  0x51   :  { %956 = vmatprep.mubr.bf16.mxu0 %v2307_v15  ;;  %v2637_v27 = vld [vmem:[#allocation2 + $0xc4] ss:$8 sps:$4 sm:$0xff]   ;;  %v2639_v28 = vld [vmem:[#allocation2 + $0xc0] ss:$8 sps:$4 sm:$0xff]   ;;  %v2640_v29 = vld [vmem:[#allocation2 + $0xd4] ss:$8 sps:$4 sm:$0xff]  }
  0x52   :  { %929 = vmatpush1.bf16.msra.mxu0 %v2609_v5  ;;  %v2642_v30 = vld [vmem:[#allocation2 + $0xd0] ss:$8 sps:$4 sm:$0xff]   ;;  %v2643_v31 = vld [vmem:[#allocation2 + $0xe4] ss:$8 sps:$4 sm:$0xff]   ;;  %v2645_v32 = vld [vmem:[#allocation2 + $0xe0] ss:$8 sps:$4 sm:$0xff]  }
  0x53   :  { %930 = vmatprep.subr.bf16.mxu0 %v2610_v6  ;;  %v2646_v33 = vld [vmem:[#allocation2 + $0xf4] ss:$8 sps:$4 sm:$0xff]   ;;  %v2648_v34 = vld [vmem:[#allocation2 + $0xf0] ss:$8 sps:$4 sm:$0xff]   ;;  %v2651_v35 = vld [vmem:[#allocation2 + $0x104] ss:$8 sps:$4 sm:$0xff]  }
  0x54   :  { %v3252_v36 = vld [vmem:[%s3449_s0 + $0x8] sm:$0xff]  ;;  %v2654_v41 = vld [vmem:[#allocation2 + $0x114] ss:$8 sps:$4 sm:$0xff]   ;;  %v2652_v42 = vld [vmem:[#allocation2 + $0x110] ss:$8 sps:$4 sm:$0xff]  }
  0x55   :  { %v3257_v37 = vld [vmem:[%s3449_s0 + $0x28] sm:$0xff]  ;;  %v2660_v45 = vld [vmem:[#allocation2 + $0x134] ss:$8 sps:$4 sm:$0xff]   ;;  %v2658_v46 = vld [vmem:[#allocation2 + $0x130] ss:$8 sps:$4 sm:$0xff]  }
  0x56   :  { %931 = vmatpush1.bf16.msra.mxu0 %v2612_v7  ;;  %v2649_v39 = vld [vmem:[#allocation2 + $0x100] ss:$8 sps:$4 sm:$0xff]   ;;  %v2309_v40 = vcombine.high %v3252_v36, %v3257_v37  ;;  %v2657_v43 = vld [vmem:[#allocation2 + $0x124] ss:$8 sps:$4 sm:$0xff]   ;;  %v2666_v49 = vld [vmem:[#allocation2 + $0x154] ss:$8 sps:$4 sm:$0xff]  }
  0x57   :  { %932 = vmatprep.subr.bf16.mxu0 %v2613_v8  ;;  %v2655_v44 = vld [vmem:[#allocation2 + $0x120] ss:$8 sps:$4 sm:$0xff]   ;;  %v2663_v47 = vld [vmem:[#allocation2 + $0x144] ss:$8 sps:$4 sm:$0xff]   ;;  %v2664_v50 = vld [vmem:[#allocation2 + $0x150] ss:$8 sps:$4 sm:$0xff]  }
  0x58   :  { %v2661_v48 = vld [vmem:[#allocation2 + $0x140] ss:$8 sps:$4 sm:$0xff]   ;;  %v2669_v51 = vld [vmem:[#allocation2 + $0x164] ss:$8 sps:$4 sm:$0xff]   ;;  %v2672_v53 = vld [vmem:[#allocation2 + $0x174] ss:$8 sps:$4 sm:$0xff]  }
  0x59   :  { %v2667_v52 = vld [vmem:[#allocation2 + $0x160] ss:$8 sps:$4 sm:$0xff]   ;;  %v2670_v54 = vld [vmem:[#allocation2 + $0x170] ss:$8 sps:$4 sm:$0xff]   ;;  %v2675_v55 = vld [vmem:[#allocation2 + $0x184] ss:$8 sps:$4 sm:$0xff]  }
  0x5a   :  { %933 = vmatpush1.bf16.msra.mxu0 %v2615_v9  ;;  %v2673_v56 = vld [vmem:[#allocation2 + $0x180] ss:$8 sps:$4 sm:$0xff]   ;;  %v2678_v57 = vld [vmem:[#allocation2 + $0x194] ss:$8 sps:$4 sm:$0xff]   ;;  %v2676_v58 = vld [vmem:[#allocation2 + $0x190] ss:$8 sps:$4 sm:$0xff]  }
  0x5b   :  { %934 = vmatprep.subr.bf16.mxu0 %v2616_v10  ;;  %v2681_v59 = vld [vmem:[#allocation2 + $0x1a4] ss:$8 sps:$4 sm:$0xff]   ;;  %v2679_v60 = vld [vmem:[#allocation2 + $0x1a0] ss:$8 sps:$4 sm:$0xff]   ;;  %v2684_v61 = vld [vmem:[#allocation2 + $0x1b4] ss:$8 sps:$4 sm:$0xff]   ;;  %v2308_v10 = vcombine.low %v3252_v36, %v3257_v37 }
  0x5c   :  { %v2682_v62 = vld [vmem:[#allocation2 + $0x1b0] ss:$8 sps:$4 sm:$0xff]   ;;  %v2687_v63 = vld [vmem:[#allocation2 + $0x1c4] ss:$8 sps:$4 sm:$0xff]   ;;  %v2685_v0 = vld [vmem:[#allocation2 + $0x1c0] ss:$8 sps:$4 sm:$0xff]  }
  0x5d   :  { %v2690_v1 = vld [vmem:[#allocation2 + $0x1d4] ss:$8 sps:$4 sm:$0xff]   ;;  %v2688_v2 = vld [vmem:[#allocation2 + $0x1d0] ss:$8 sps:$4 sm:$0xff]   ;;  %v2693_v3 = vld [vmem:[#allocation2 + $0x1e4] ss:$8 sps:$4 sm:$0xff]  }
  0x5e   :  { %935 = vmatpush1.bf16.msra.mxu0 %v2618_v11  ;;  %v2691_v4 = vld [vmem:[#allocation2 + $0x1e0] ss:$8 sps:$4 sm:$0xff]   ;;  %v2696_v5 = vld [vmem:[#allocation2 + $0x1f4] ss:$8 sps:$4 sm:$0xff]   ;;  %v2694_v6 = vld [vmem:[#allocation2 + $0x1f0] ss:$8 sps:$4 sm:$0xff]  }
  0x5f   :  { %936 = vmatprep.subr.bf16.mxu0 %v2619_v12  ;;  %v2699_v7 = vld [vmem:[#allocation2 + $0x204] ss:$8 sps:$4 sm:$0xff]   ;;  %v3264_v8 = vld [vmem:[%s3449_s0 + $0x10] sm:$0xff]  ;;  %v2697_v11 = vld [vmem:[#allocation2 + $0x200] ss:$8 sps:$4 sm:$0xff]  }
  0x60   :  { %v3269_v9 = vld [vmem:[%s3449_s0 + $0x30] sm:$0xff]  ;;  %v2793_v14 = vld [vmem:[%s3451_s2 + $0x4] ss:$8 sps:$4 sm:$0xff]   ;;  %v2795_v15 = vld [vmem:[%s3451_s2] ss:$8 sps:$4 sm:$0xff]  }
  0x61   :  { %v2702_v12 = vld [vmem:[#allocation2 + $0x214] ss:$8 sps:$4 sm:$0xff]   ;;  %v2311_v13 = vcombine.high %v3264_v8, %v3269_v9  ;;  %1337 = vmatprep.subr.bf16.mxu1 %v2793_v14  ;;  %v2811_v36 = vld [vmem:[%s3451_s2 + $0x64] ss:$8 sps:$4 sm:$0xff]   ;;  %v2715_v37 = vld [vmem:[#allocation2 + $0x260] ss:$8 sps:$4 sm:$0xff]  }
  0x62   :  { %937 = vmatpush1.bf16.msra.mxu0 %v2621_v16  ;;  %v2796_v16 = vld [vmem:[%s3451_s2 + $0x14] ss:$8 sps:$4 sm:$0xff]   ;;  %1338 = vmatpush1.bf16.msra.mxu1 %v2795_v15  ;;  %v2745_v14 = vld [vmem:[#allocation2 + $0x300] ss:$8 sps:$4 sm:$0xff]  }
  0x63   :  { %938 = vmatprep.subr.bf16.mxu0 %v2622_v17  ;;  %v2700_v17 = vld [vmem:[#allocation2 + $0x210] ss:$8 sps:$4 sm:$0xff]   ;;  %1339 = vmatprep.subr.bf16.mxu1 %v2796_v16  ;;  %v2750_v16 = vld [vmem:[#allocation2 + $0x314] ss:$8 sps:$4 sm:$0xff]  }
  0x66   :  { %939 = vmatpush1.bf16.msra.mxu0 %v2624_v18  ;;  %v2705_v18 = vld [vmem:[#allocation2 + $0x224] ss:$8 sps:$4 sm:$0xff]  }
  0x67   :  { %940 = vmatprep.subr.bf16.mxu0 %v2625_v19  ;;  %v2798_v19 = vld [vmem:[%s3451_s2 + $0x10] ss:$8 sps:$4 sm:$0xff]  }
  0x68   :  { %1340 = vmatpush1.bf16.msra.mxu1 %v2798_v19  ;;  %v2751_v19 = vld [vmem:[#allocation2 + $0x320] ss:$8 sps:$4 sm:$0xff]  }
  0x6a   :  { %941 = vmatpush1.bf16.msra.mxu0 %v2627_v20  ;;  %v2799_v20 = vld [vmem:[%s3451_s2 + $0x24] ss:$8 sps:$4 sm:$0xff]  }
  0x6b   :  { %942 = vmatprep.subr.bf16.mxu0 %v2628_v21  ;;  %v2703_v21 = vld [vmem:[#allocation2 + $0x220] ss:$8 sps:$4 sm:$0xff]   ;;  %1341 = vmatprep.subr.bf16.mxu1 %v2799_v20  ;;  %v2756_v20 = vld [vmem:[#allocation2 + $0x334] ss:$8 sps:$4 sm:$0xff]  }
  0x6e   :  { %943 = vmatpush1.bf16.msra.mxu0 %v2630_v22  ;;  %v2708_v22 = vld [vmem:[#allocation2 + $0x234] ss:$8 sps:$4 sm:$0xff]  }
  0x6f   :  { %944 = vmatprep.subr.bf16.mxu0 %v2631_v23  ;;  %v2801_v23 = vld [vmem:[%s3451_s2 + $0x20] ss:$8 sps:$4 sm:$0xff]  }
  0x70   :  { %1342 = vmatpush1.bf16.msra.mxu1 %v2801_v23  ;;  %v2760_v23 = vld [vmem:[#allocation2 + $0x350] ss:$8 sps:$4 sm:$0xff]  }
  0x72   :  { %945 = vmatpush1.bf16.msra.mxu0 %v2633_v24  ;;  %v2802_v24 = vld [vmem:[%s3451_s2 + $0x34] ss:$8 sps:$4 sm:$0xff]  }
  0x73   :  { %946 = vmatprep.subr.bf16.mxu0 %v2634_v25  ;;  %v2706_v25 = vld [vmem:[#allocation2 + $0x230] ss:$8 sps:$4 sm:$0xff]   ;;  %1343 = vmatprep.subr.bf16.mxu1 %v2802_v24  ;;  %v2765_v24 = vld [vmem:[#allocation2 + $0x364] ss:$8 sps:$4 sm:$0xff]  }
  0x76   :  { %947 = vmatpush1.bf16.msra.mxu0 %v2636_v26  ;;  %v2711_v26 = vld [vmem:[#allocation2 + $0x244] ss:$8 sps:$4 sm:$0xff]  }
  0x77   :  { %948 = vmatprep.subr.bf16.mxu0 %v2637_v27  ;;  %v2804_v27 = vld [vmem:[%s3451_s2 + $0x30] ss:$8 sps:$4 sm:$0xff]  }
  0x78   :  { %1344 = vmatpush1.bf16.msra.mxu1 %v2804_v27  ;;  %v2766_v27 = vld [vmem:[#allocation2 + $0x370] ss:$8 sps:$4 sm:$0xff]  }
  0x7a   :  { %949 = vmatpush1.bf16.msra.mxu0 %v2639_v28  ;;  %v2805_v28 = vld [vmem:[%s3451_s2 + $0x44] ss:$8 sps:$4 sm:$0xff]  }
  0x7b   :  { %950 = vmatprep.subr.bf16.mxu0 %v2640_v29  ;;  %v2709_v29 = vld [vmem:[#allocation2 + $0x240] ss:$8 sps:$4 sm:$0xff]   ;;  %1345 = vmatprep.subr.bf16.mxu1 %v2805_v28  ;;  %v2771_v28 = vld [vmem:[#allocation2 + $0x384] ss:$8 sps:$4 sm:$0xff]  }
  0x7e   :  { %951 = vmatpush1.bf16.msra.mxu0 %v2642_v30  ;;  %v2714_v30 = vld [vmem:[#allocation2 + $0x254] ss:$8 sps:$4 sm:$0xff]  }
  0x7f   :  { %952 = vmatprep.subr.bf16.mxu0 %v2643_v31  ;;  %v2807_v31 = vld [vmem:[%s3451_s2 + $0x40] ss:$8 sps:$4 sm:$0xff]  }
  0x80   :  { %1346 = vmatpush1.bf16.msra.mxu1 %v2807_v31  ;;  %v2772_v31 = vld [vmem:[#allocation2 + $0x390] ss:$8 sps:$4 sm:$0xff]  }
  0x82   :  { %953 = vmatpush1.bf16.msra.mxu0 %v2645_v32  ;;  %v2808_v32 = vld [vmem:[%s3451_s2 + $0x54] ss:$8 sps:$4 sm:$0xff]  }
  0x83   :  { %954 = vmatprep.subr.bf16.mxu0 %v2646_v33  ;;  %v2712_v33 = vld [vmem:[#allocation2 + $0x250] ss:$8 sps:$4 sm:$0xff]   ;;  %1347 = vmatprep.subr.bf16.mxu1 %v2808_v32  ;;  %v2777_v32 = vld [vmem:[#allocation2 + $0x3a4] ss:$8 sps:$4 sm:$0xff]  }
  0x86   :  { %955 = vmatpush1.bf16.msra.mxu0 %v2648_v34  ;;  %v2717_v34 = vld [vmem:[#allocation2 + $0x264] ss:$8 sps:$4 sm:$0xff]  }
  0x87   :  { %967 = vmatprep.subr.bf16.mxu0 %v2651_v35  ;;  %v2810_v35 = vld [vmem:[%s3451_s2 + $0x50] ss:$8 sps:$4 sm:$0xff]  }
  0x88   :  { %1348 = vmatpush1.bf16.msra.mxu1 %v2810_v35  ;;  %v2778_v35 = vld [vmem:[#allocation2 + $0x3b0] ss:$8 sps:$4 sm:$0xff]  }
  0x89   :  { %957 = vmatmul.mubr.bf16.vlgmr.msra.gmra.mrb[0].mxu0 %v2306_v38  ;;  %v2720_v38 = vld [vmem:[#allocation2 + $0x274] ss:$8 sps:$4 sm:$0xff]   ;;  %1349 = vmatprep.subr.bf16.mxu1 %v2811_v36  ;;  %v2783_v36 = vld [vmem:[#allocation2 + $0x3c4] ss:$8 sps:$4 sm:$0xff]  }
  0x8a   :  { %968 = vmatpush1.bf16.msra.mxu0 %v2649_v39  ;;  %999 = vmatprep.mubr.bf16.mxu0 %v2309_v40  ;;  %v2813_v39 = vld [vmem:[%s3451_s2 + $0x60] ss:$8 sps:$4 sm:$0xff]   ;;  %v2814_v40 = vld [vmem:[%s3451_s2 + $0x74] ss:$8 sps:$4 sm:$0xff]  }
  0x8b   :  { %969 = vmatprep.subr.bf16.mxu0 %v2654_v41  ;;  %v2718_v41 = vld [vmem:[#allocation2 + $0x270] ss:$8 sps:$4 sm:$0xff]  }
  0x8c   :  { %1350 = vmatpush1.bf16.msra.mxu1 %v2813_v39  ;;  %v2784_v39 = vld [vmem:[#allocation2 + $0x3d0] ss:$8 sps:$4 sm:$0xff]  }
  0x8d   :  { %1351 = vmatprep.subr.bf16.mxu1 %v2814_v40  ;;  %v2789_v40 = vld [vmem:[#allocation2 + $0x3e4] ss:$8 sps:$4 sm:$0xff]  }
  0x8e   :  { %970 = vmatpush1.bf16.msra.mxu0 %v2652_v42  ;;  %v2723_v42 = vld [vmem:[#allocation2 + $0x284] ss:$8 sps:$4 sm:$0xff]  }
  0x8f   :  { %971 = vmatprep.subr.bf16.mxu0 %v2657_v43  ;;  %v2816_v43 = vld [vmem:[%s3451_s2 + $0x70] ss:$8 sps:$4 sm:$0xff]  }
  0x90   :  { %1352 = vmatpush1.bf16.msra.mxu1 %v2816_v43  ;;  %v2790_v43 = vld [vmem:[#allocation2 + $0x3f0] ss:$8 sps:$4 sm:$0xff]  }
  0x92   :  { %972 = vmatpush1.bf16.msra.mxu0 %v2655_v44  ;;  %v2817_v44 = vld [vmem:[%s3451_s2 + $0x84] ss:$8 sps:$4 sm:$0xff]  }
  0x93   :  { %973 = vmatprep.subr.bf16.mxu0 %v2660_v45  ;;  %v2721_v45 = vld [vmem:[#allocation2 + $0x280] ss:$8 sps:$4 sm:$0xff]   ;;  %1353 = vmatprep.subr.bf16.mxu1 %v2817_v44 }
  0x96   :  { %974 = vmatpush1.bf16.msra.mxu0 %v2658_v46  ;;  %v2726_v46 = vld [vmem:[#allocation2 + $0x294] ss:$8 sps:$4 sm:$0xff]  }
  0x97   :  { %975 = vmatprep.subr.bf16.mxu0 %v2663_v47  ;;  %v2819_v47 = vld [vmem:[%s3451_s2 + $0x80] ss:$8 sps:$4 sm:$0xff]  }
  0x98   :  { %1354 = vmatpush1.bf16.msra.mxu1 %v2819_v47  ;;  %v2840_v47 = vld [vmem:[%s3451_s2 + $0xf0] ss:$8 sps:$4 sm:$0xff]  }
  0x9a   :  { %976 = vmatpush1.bf16.msra.mxu0 %v2661_v48  ;;  %v2820_v48 = vld [vmem:[%s3451_s2 + $0x94] ss:$8 sps:$4 sm:$0xff]  }
  0x9b   :  { %977 = vmatprep.subr.bf16.mxu0 %v2666_v49  ;;  %v2724_v49 = vld [vmem:[#allocation2 + $0x290] ss:$8 sps:$4 sm:$0xff]   ;;  %1355 = vmatprep.subr.bf16.mxu1 %v2820_v48 }
  0x9e   :  { %978 = vmatpush1.bf16.msra.mxu0 %v2664_v50  ;;  %v2729_v50 = vld [vmem:[#allocation2 + $0x2a4] ss:$8 sps:$4 sm:$0xff]  }
  0x9f   :  { %979 = vmatprep.subr.bf16.mxu0 %v2669_v51  ;;  %v2822_v51 = vld [vmem:[%s3451_s2 + $0x90] ss:$8 sps:$4 sm:$0xff]  }
  0xa0   :  { %1356 = vmatpush1.bf16.msra.mxu1 %v2822_v51 }
  0xa2   :  { %980 = vmatpush1.bf16.msra.mxu0 %v2667_v52  ;;  %v2823_v52 = vld [vmem:[%s3451_s2 + $0xa4] ss:$8 sps:$4 sm:$0xff]  }
  0xa3   :  { %981 = vmatprep.subr.bf16.mxu0 %v2672_v53  ;;  %v2727_v53 = vld [vmem:[#allocation2 + $0x2a0] ss:$8 sps:$4 sm:$0xff]   ;;  %1357 = vmatprep.subr.bf16.mxu1 %v2823_v52 }
  0xa6   :  { %982 = vmatpush1.bf16.msra.mxu0 %v2670_v54  ;;  %v2732_v54 = vld [vmem:[#allocation2 + $0x2b4] ss:$8 sps:$4 sm:$0xff]  }
  0xa7   :  { %983 = vmatprep.subr.bf16.mxu0 %v2675_v55  ;;  %v2825_v55 = vld [vmem:[%s3451_s2 + $0xa0] ss:$8 sps:$4 sm:$0xff]  }
  0xa8   :  { %1358 = vmatpush1.bf16.msra.mxu1 %v2825_v55 }
  0xaa   :  { %984 = vmatpush1.bf16.msra.mxu0 %v2673_v56  ;;  %v2826_v56 = vld [vmem:[%s3451_s2 + $0xb4] ss:$8 sps:$4 sm:$0xff]  }
  0xab   :  { %985 = vmatprep.subr.bf16.mxu0 %v2678_v57  ;;  %v2730_v57 = vld [vmem:[#allocation2 + $0x2b0] ss:$8 sps:$4 sm:$0xff]   ;;  %1359 = vmatprep.subr.bf16.mxu1 %v2826_v56  ;;  %v2843_v56 = vld [vmem:[#allocation4 + $0x4] ss:$8 sps:$4 sm:$0xff]  }
  0xae   :  { %986 = vmatpush1.bf16.msra.mxu0 %v2676_v58  ;;  %v2735_v58 = vld [vmem:[#allocation2 + $0x2c4] ss:$8 sps:$4 sm:$0xff]  }
  0xaf   :  { %987 = vmatprep.subr.bf16.mxu0 %v2681_v59  ;;  %v2828_v59 = vld [vmem:[%s3451_s2 + $0xb0] ss:$8 sps:$4 sm:$0xff]  }
  0xb0   :  { %1360 = vmatpush1.bf16.msra.mxu1 %v2828_v59  ;;  %v2844_v59 = vld [vmem:[#allocation4 + $0x10] ss:$8 sps:$4 sm:$0xff]  }
  0xb2   :  { %988 = vmatpush1.bf16.msra.mxu0 %v2679_v60  ;;  %v2829_v60 = vld [vmem:[%s3451_s2 + $0xc4] ss:$8 sps:$4 sm:$0xff]  }
  0xb3   :  { %989 = vmatprep.subr.bf16.mxu0 %v2684_v61  ;;  %v2733_v61 = vld [vmem:[#allocation2 + $0x2c0] ss:$8 sps:$4 sm:$0xff]   ;;  %1361 = vmatprep.subr.bf16.mxu1 %v2829_v60  ;;  %v2849_v60 = vld [vmem:[#allocation4 + $0x24] ss:$8 sps:$4 sm:$0xff]  }
  0xb6   :  { %990 = vmatpush1.bf16.msra.mxu0 %v2682_v62  ;;  %v2738_v62 = vld [vmem:[#allocation2 + $0x2d4] ss:$8 sps:$4 sm:$0xff]  }
  0xb7   :  { %991 = vmatprep.subr.bf16.mxu0 %v2687_v63  ;;  %v2831_v63 = vld [vmem:[%s3451_s2 + $0xc0] ss:$8 sps:$4 sm:$0xff]  }
  0xb8   :  { %1362 = vmatpush1.bf16.msra.mxu1 %v2831_v63  ;;  %v2850_v63 = vld [vmem:[#allocation4 + $0x30] ss:$8 sps:$4 sm:$0xff]  }
  0xba   :  { %992 = vmatpush1.bf16.msra.mxu0 %v2685_v0  ;;  %v2832_v0 = vld [vmem:[%s3451_s2 + $0xd4] ss:$8 sps:$4 sm:$0xff]  }
  0xbb   :  { %993 = vmatprep.subr.bf16.mxu0 %v2690_v1  ;;  %v2736_v1 = vld [vmem:[#allocation2 + $0x2d0] ss:$8 sps:$4 sm:$0xff]   ;;  %1363 = vmatprep.subr.bf16.mxu1 %v2832_v0  ;;  %v2855_v0 = vld [vmem:[#allocation4 + $0x44] ss:$8 sps:$4 sm:$0xff]  }
  0xbe   :  { %994 = vmatpush1.bf16.msra.mxu0 %v2688_v2  ;;  %v2741_v2 = vld [vmem:[#allocation2 + $0x2e4] ss:$8 sps:$4 sm:$0xff]  }
  0xbf   :  { %995 = vmatprep.subr.bf16.mxu0 %v2693_v3  ;;  %v2834_v3 = vld [vmem:[%s3451_s2 + $0xd0] ss:$8 sps:$4 sm:$0xff]  }
  0xc0   :  { %1364 = vmatpush1.bf16.msra.mxu1 %v2834_v3  ;;  %v2856_v3 = vld [vmem:[#allocation4 + $0x50] ss:$8 sps:$4 sm:$0xff]  }
  0xc2   :  { %996 = vmatpush1.bf16.msra.mxu0 %v2691_v4  ;;  %v2835_v4 = vld [vmem:[%s3451_s2 + $0xe4] ss:$8 sps:$4 sm:$0xff]  }
  0xc3   :  { %997 = vmatprep.subr.bf16.mxu0 %v2696_v5  ;;  %v2739_v5 = vld [vmem:[#allocation2 + $0x2e0] ss:$8 sps:$4 sm:$0xff]   ;;  %1365 = vmatprep.subr.bf16.mxu1 %v2835_v4  ;;  %v2861_v4 = vld [vmem:[#allocation4 + $0x64] ss:$8 sps:$4 sm:$0xff]  }
  0xc6   :  { %998 = vmatpush1.bf16.msra.mxu0 %v2694_v6  ;;  %v2744_v6 = vld [vmem:[#allocation2 + $0x2f4] ss:$8 sps:$4 sm:$0xff]  }
  0xc7   :  { %1010 = vmatprep.subr.bf16.mxu0 %v2699_v7  ;;  %v2742_v7 = vld [vmem:[#allocation2 + $0x2f0] ss:$8 sps:$4 sm:$0xff]  }
  0xc9   :  { %1000 = vmatmul.mubr.bf16.vlgmr.msra.gmra.mrb[0].mxu0 %v2308_v10  ;;  %v2747_v10 = vld [vmem:[#allocation2 + $0x304] ss:$8 sps:$4 sm:$0xff]  }
  0xca   :  { %1011 = vmatpush1.bf16.msra.mxu0 %v2697_v11  ;;  %1042 = vmatprep.mubr.bf16.mxu0 %v2311_v13  ;;  %v3365_v11 = vld [vmem:[%s3449_s0 + $0x18] sm:$0xff]  ;;  %v2310_v13 = vcombine.low %v3264_v8, %v3269_v9  ;;  %v2759_v8 = vld [vmem:[#allocation2 + $0x344] ss:$8 sps:$4 sm:$0xff]   ;;  %v2757_v9 = vld [vmem:[#allocation2 + $0x340] ss:$8 sps:$4 sm:$0xff]  }
  0xcb   :  { %1012 = vmatprep.subr.bf16.mxu0 %v2702_v12  ;;  %v3370_v12 = vld [vmem:[%s3449_s0 + $0x38] sm:$0xff] }
  0xcc   :  { %v2313_v15 = vcombine.high %v3365_v11, %v3370_v12  ;;  %v2312_v44 = vcombine.low %v3365_v11, %v3370_v12  ;;  %v2865_v11 = vld [vmem:[#allocation4 + $0x80] ss:$8 sps:$4 sm:$0xff]   ;;  %v2870_v12 = vld [vmem:[#allocation4 + $0x94] ss:$8 sps:$4 sm:$0xff]  }
  0xce   :  { %1013 = vmatpush1.bf16.msra.mxu0 %v2700_v17  ;;  %v2748_v17 = vld [vmem:[#allocation2 + $0x310] ss:$8 sps:$4 sm:$0xff]  }
  0xcf   :  { %1014 = vmatprep.subr.bf16.mxu0 %v2705_v18  ;;  %v2753_v18 = vld [vmem:[#allocation2 + $0x324] ss:$8 sps:$4 sm:$0xff]  }
  0xd2   :  { %1015 = vmatpush1.bf16.msra.mxu0 %v2703_v21  ;;  %v2754_v21 = vld [vmem:[#allocation2 + $0x330] ss:$8 sps:$4 sm:$0xff]  }
  0xd3   :  { %1016 = vmatprep.subr.bf16.mxu0 %v2708_v22  ;;  %v2762_v22 = vld [vmem:[#allocation2 + $0x354] ss:$8 sps:$4 sm:$0xff]  }
  0xd6   :  { %1017 = vmatpush1.bf16.msra.mxu0 %v2706_v25  ;;  %v2763_v25 = vld [vmem:[#allocation2 + $0x360] ss:$8 sps:$4 sm:$0xff]  }
  0xd7   :  { %1018 = vmatprep.subr.bf16.mxu0 %v2711_v26  ;;  %v2768_v26 = vld [vmem:[#allocation2 + $0x374] ss:$8 sps:$4 sm:$0xff]  }
  0xda   :  { %1019 = vmatpush1.bf16.msra.mxu0 %v2709_v29  ;;  %v2769_v29 = vld [vmem:[#allocation2 + $0x380] ss:$8 sps:$4 sm:$0xff]  }
  0xdb   :  { %1020 = vmatprep.subr.bf16.mxu0 %v2714_v30  ;;  %v2774_v30 = vld [vmem:[#allocation2 + $0x394] ss:$8 sps:$4 sm:$0xff]  }
  0xde   :  { %1021 = vmatpush1.bf16.msra.mxu0 %v2712_v33  ;;  %v2775_v33 = vld [vmem:[#allocation2 + $0x3a0] ss:$8 sps:$4 sm:$0xff]  }
  0xdf   :  { %1022 = vmatprep.subr.bf16.mxu0 %v2717_v34  ;;  %v2780_v34 = vld [vmem:[#allocation2 + $0x3b4] ss:$8 sps:$4 sm:$0xff]  }
  0xe2   :  { %1023 = vmatpush1.bf16.msra.mxu0 %v2715_v37  ;;  %v2781_v37 = vld [vmem:[#allocation2 + $0x3c0] ss:$8 sps:$4 sm:$0xff]  }
  0xe3   :  { %1024 = vmatprep.subr.bf16.mxu0 %v2720_v38  ;;  %v2786_v38 = vld [vmem:[#allocation2 + $0x3d4] ss:$8 sps:$4 sm:$0xff]  }
  0xe6   :  { %1025 = vmatpush1.bf16.msra.mxu0 %v2718_v41  ;;  %v2787_v41 = vld [vmem:[#allocation2 + $0x3e0] ss:$8 sps:$4 sm:$0xff]  }
  0xe7   :  { %1026 = vmatprep.subr.bf16.mxu0 %v2723_v42  ;;  %v2792_v42 = vld [vmem:[#allocation2 + $0x3f4] ss:$8 sps:$4 sm:$0xff]  }
  0xea   :  { %1027 = vmatpush1.bf16.msra.mxu0 %v2721_v45  ;;  %v2837_v45 = vld [vmem:[%s3451_s2 + $0xe0] ss:$8 sps:$4 sm:$0xff]  }
  0xeb   :  { %1028 = vmatprep.subr.bf16.mxu0 %v2726_v46  ;;  %1366 = vmatpush1.bf16.msra.mxu1 %v2837_v45  ;;  %v2838_v46 = vld [vmem:[%s3451_s2 + $0xf4] ss:$8 sps:$4 sm:$0xff]  }
  0xec   :  { %1367 = vmatprep.subr.bf16.mxu1 %v2838_v46 }
  0xee   :  { %1029 = vmatpush1.bf16.msra.mxu0 %v2724_v49 }
  0xef   :  { %1030 = vmatprep.subr.bf16.mxu0 %v2729_v50  ;;  %1368 = vmatpush1.bf16.msra.mxu1 %v2840_v47 }
  0xf0   :  { %1643 = vmatprep.subr.bf16.mxu1 %v2843_v56 }
  0xf2   :  { %1031 = vmatpush1.bf16.msra.mxu0 %v2727_v53 }
  0xf3   :  { %1032 = vmatprep.subr.bf16.mxu0 %v2732_v54 }
  0xf6   :  { %1033 = vmatpush1.bf16.msra.mxu0 %v2730_v57  ;;  %v2841_v57 = vld [vmem:[#allocation4] ss:$8 sps:$4 sm:$0xff]  }
  0xf7   :  { %1034 = vmatprep.subr.bf16.mxu0 %v2735_v58  ;;  %v2846_v58 = vld [vmem:[#allocation4 + $0x14] ss:$8 sps:$4 sm:$0xff]  }
  0xfa   :  { %1035 = vmatpush1.bf16.msra.mxu0 %v2733_v61  ;;  %v2847_v61 = vld [vmem:[#allocation4 + $0x20] ss:$8 sps:$4 sm:$0xff]  }
  0xfb   :  { %1036 = vmatprep.subr.bf16.mxu0 %v2738_v62  ;;  %v2852_v62 = vld [vmem:[#allocation4 + $0x34] ss:$8 sps:$4 sm:$0xff]  }
  0xfe   :  { %1037 = vmatpush1.bf16.msra.mxu0 %v2736_v1  ;;  %v2853_v1 = vld [vmem:[#allocation4 + $0x40] ss:$8 sps:$4 sm:$0xff]  }
  0xff   :  { %1038 = vmatprep.subr.bf16.mxu0 %v2741_v2  ;;  %v2858_v2 = vld [vmem:[#allocation4 + $0x54] ss:$8 sps:$4 sm:$0xff]  }
 0x102   :  { %1039 = vmatpush1.bf16.msra.mxu0 %v2739_v5  ;;  %v2859_v5 = vld [vmem:[#allocation4 + $0x60] ss:$8 sps:$4 sm:$0xff]  }
 0x103   :  { %1040 = vmatprep.subr.bf16.mxu0 %v2744_v6  ;;  %v2864_v6 = vld [vmem:[#allocation4 + $0x74] ss:$8 sps:$4 sm:$0xff]  }
 0x106   :  { %1041 = vmatpush1.bf16.msra.mxu0 %v2742_v7  ;;  %v2862_v7 = vld [vmem:[#allocation4 + $0x70] ss:$8 sps:$4 sm:$0xff]  }
 0x107   :  { %1053 = vmatprep.subr.bf16.mxu0 %v2747_v10  ;;  %v2867_v10 = vld [vmem:[#allocation4 + $0x84] ss:$8 sps:$4 sm:$0xff]  }
 0x109   :  { %1043 = vmatmul.mubr.bf16.vlgmr.msra.gmra.mrb[0].mxu0 %v2310_v13  ;;  %v2868_v13 = vld [vmem:[#allocation4 + $0x90] ss:$8 sps:$4 sm:$0xff]  }
 0x10a   :  { %1054 = vmatpush1.bf16.msra.mxu0 %v2745_v14  ;;  %1085 = vmatprep.mubr.bf16.mxu0 %v2313_v15  ;;  %v2873_v14 = vld [vmem:[#allocation4 + $0xa4] ss:$8 sps:$4 sm:$0xff]   ;;  %v2871_v15 = vld [vmem:[#allocation4 + $0xa0] ss:$8 sps:$4 sm:$0xff]  }
 0x10b   :  { %1055 = vmatprep.subr.bf16.mxu0 %v2750_v16  ;;  %v2876_v16 = vld [vmem:[#allocation4 + $0xb4] ss:$8 sps:$4 sm:$0xff]  }
 0x10e   :  { %1056 = vmatpush1.bf16.msra.mxu0 %v2748_v17  ;;  %v2874_v17 = vld [vmem:[#allocation4 + $0xb0] ss:$8 sps:$4 sm:$0xff]  }
 0x10f   :  { %1057 = vmatprep.subr.bf16.mxu0 %v2753_v18  ;;  %v2879_v18 = vld [vmem:[#allocation4 + $0xc4] ss:$8 sps:$4 sm:$0xff]  }
 0x112   :  { %1058 = vmatpush1.bf16.msra.mxu0 %v2751_v19  ;;  %v2877_v19 = vld [vmem:[#allocation4 + $0xc0] ss:$8 sps:$4 sm:$0xff]  }
 0x113   :  { %1059 = vmatprep.subr.bf16.mxu0 %v2756_v20  ;;  %v2882_v20 = vld [vmem:[#allocation4 + $0xd4] ss:$8 sps:$4 sm:$0xff]  }
 0x116   :  { %1060 = vmatpush1.bf16.msra.mxu0 %v2754_v21  ;;  %v2880_v21 = vld [vmem:[#allocation4 + $0xd0] ss:$8 sps:$4 sm:$0xff]  }
 0x117   :  { %1061 = vmatprep.subr.bf16.mxu0 %v2759_v8  ;;  %v2885_v8 = vld [vmem:[#allocation4 + $0xe4] ss:$8 sps:$4 sm:$0xff]  }
 0x11a   :  { %1062 = vmatpush1.bf16.msra.mxu0 %v2757_v9  ;;  %v2883_v9 = vld [vmem:[#allocation4 + $0xe0] ss:$8 sps:$4 sm:$0xff]  }
 0x11b   :  { %1063 = vmatprep.subr.bf16.mxu0 %v2762_v22  ;;  %v2886_v22 = vld [vmem:[#allocation4 + $0xf0] ss:$8 sps:$4 sm:$0xff]  }
 0x11e   :  { %1064 = vmatpush1.bf16.msra.mxu0 %v2760_v23  ;;  %v2888_v23 = vld [vmem:[#allocation4 + $0xf4] ss:$8 sps:$4 sm:$0xff]  }
 0x11f   :  { %1065 = vmatprep.subr.bf16.mxu0 %v2765_v24  ;;  %v2891_v24 = vld [vmem:[#allocation6 + $0x4] ss:$8 sps:$4 sm:$0xff]  }
 0x122   :  { %1066 = vmatpush1.bf16.msra.mxu0 %v2763_v25  ;;  %v99_v25 = vlaneseq }
 0x123   :  { %1067 = vmatprep.subr.bf16.mxu0 %v2768_v26 }
 0x124   :  { %v100_v26 = vshrl.u32 %v99_v25, 7 }
 0x126   :  { %1068 = vmatpush1.bf16.msra.mxu0 %v2766_v27  ;;  %vm102_vm0 = vcmp.lt.s32.totalorder %v100_v26, 2  ;;  %v3093_v27 = vmov 0.0  }
 0x127   :  { %1069 = vmatprep.subr.bf16.mxu0 %v2771_v28  ;;  %v3393_v28 = vsel %vm102_vm0, 1.0, %v3093_v27 }
 0x12a   :  { %1070 = vmatpush1.bf16.msra.mxu0 %v2769_v29 }
 0x12b   :  { %1071 = vmatprep.subr.bf16.mxu0 %v2774_v30 }
 0x12e   :  { %1072 = vmatpush1.bf16.msra.mxu0 %v2772_v31 }
 0x12f   :  { %1073 = vmatprep.subr.bf16.mxu0 %v2777_v32 }
 0x132   :  { %1074 = vmatpush1.bf16.msra.mxu0 %v2775_v33 }
 0x133   :  { %1075 = vmatprep.subr.bf16.mxu0 %v2780_v34 }
 0x136   :  { %1076 = vmatpush1.bf16.msra.mxu0 %v2778_v35 }
 0x137   :  { %1077 = vmatprep.subr.bf16.mxu0 %v2783_v36 }
 0x13a   :  { %1078 = vmatpush1.bf16.msra.mxu0 %v2781_v37 }
 0x13b   :  { %1079 = vmatprep.subr.bf16.mxu0 %v2786_v38 }
 0x13e   :  { %1080 = vmatpush1.bf16.msra.mxu0 %v2784_v39 }
 0x13f   :  { %1081 = vmatprep.subr.bf16.mxu0 %v2789_v40 }
 0x142   :  { %1082 = vmatpush1.bf16.msra.mxu0 %v2787_v41 }
 0x143   :  { %1083 = vmatprep.subr.bf16.mxu0 %v2792_v42 }
 0x146   :  { %1084 = vmatpush1.bf16.msra.mxu0 %v2790_v43 }
 0x149   :  { %1086 = vmatmul.mubr.bf16.vlgmr.msra.gmra.mrb[0].mxu0 %v2312_v44 }
 0x21c   :  { %v1087_v48 = vpop.f32.mrb[0].mxu0 }
 0x21d   :  { %v1089_v49 = vpop.f32.mrb[1].mxu0 }
 0x21e   :  { %v2576_v50 = vpack.c.bf16 %v1089_v49, %v1087_v48  ;;  %v1091_v51 = vpop.f32.mrb[2].mxu0 }
 0x21f   :  { %v1096_v52 = vpack.c.bf16 %v1091_v51, %v1087_v48  ;;  %v1093_v53 = vpop.f32.mrb[3].mxu0 }
 0x220   :  { %1108 = vst [vmem:[%s3461_s12] sm:$0xff] %v2576_v50  ;;  %v2577_v54 = vpack.c.bf16 %v1093_v53, %v1091_v51  ;;  %v1097_v55 = vpack.c.bf16 %v1093_v53, %v1089_v49 }
 0x222   :  { %1109 = vst [vmem:[%s3461_s12 + $0x8] sm:$0xff] %v2577_v54  ;;  %1369 = vmatprep.mubr.bf16.mxu1 %v1097_v55 }
 0x223   :  { %1370 = vmatmul.mubr.bf16.vlgmr.msra.gmra.mrb[0].mxu1 %v1096_v52 }
 0x224   :  { %1644 = vmatpush1.bf16.msra.mxu1 %v2841_v57 }
 0x225   :  { %1645 = vmatprep.subr.bf16.mxu1 %v2846_v58 }
 0x228   :  { %1646 = vmatpush1.bf16.msra.mxu1 %v2844_v59 }
 0x229   :  { %1647 = vmatprep.subr.bf16.mxu1 %v2849_v60 }
 0x22c   :  { %1648 = vmatpush1.bf16.msra.mxu1 %v2847_v61 }
 0x22d   :  { %1649 = vmatprep.subr.bf16.mxu1 %v2852_v62 }
 0x230   :  { %1650 = vmatpush1.bf16.msra.mxu1 %v2850_v63 }
 0x231   :  { %1651 = vmatprep.subr.bf16.mxu1 %v2855_v0 }
 0x234   :  { %1652 = vmatpush1.bf16.msra.mxu1 %v2853_v1 }
 0x235   :  { %1653 = vmatprep.subr.bf16.mxu1 %v2858_v2 }
 0x238   :  { %1654 = vmatpush1.bf16.msra.mxu1 %v2856_v3 }
 0x239   :  { %1655 = vmatprep.subr.bf16.mxu1 %v2861_v4 }
 0x23c   :  { %1656 = vmatpush1.bf16.msra.mxu1 %v2859_v5 }
 0x23d   :  { %1657 = vmatprep.subr.bf16.mxu1 %v2864_v6 }
 0x240   :  { %1658 = vmatpush1.bf16.msra.mxu1 %v2862_v7 }
 0x241   :  { %1659 = vmatprep.subr.bf16.mxu1 %v2867_v10 }
 0x244   :  { %1660 = vmatpush1.bf16.msra.mxu1 %v2865_v11 }
 0x245   :  { %1661 = vmatprep.subr.bf16.mxu1 %v2870_v12 }
 0x248   :  { %1662 = vmatpush1.bf16.msra.mxu1 %v2868_v13 }
 0x249   :  { %1663 = vmatprep.subr.bf16.mxu1 %v2873_v14 }
 0x24c   :  { %1664 = vmatpush1.bf16.msra.mxu1 %v2871_v15 }
 0x24d   :  { %1665 = vmatprep.subr.bf16.mxu1 %v2876_v16 }
 0x250   :  { %1666 = vmatpush1.bf16.msra.mxu1 %v2874_v17 }
 0x251   :  { %1667 = vmatprep.subr.bf16.mxu1 %v2879_v18 }
 0x254   :  { %1668 = vmatpush1.bf16.msra.mxu1 %v2877_v19 }
 0x255   :  { %1669 = vmatprep.subr.bf16.mxu1 %v2882_v20 }
 0x258   :  { %1670 = vmatpush1.bf16.msra.mxu1 %v2880_v21  ;;  %v3399_v21 = vsub.s32 0, %v100_v26 }
 0x259   :  { %1671 = vmatprep.subr.bf16.mxu1 %v2885_v8  ;;  %v1142_v8 = vld [vmem:[%s3452_s3] sm:$0x3] }
 0x25c   :  { %1672 = vmatpush1.bf16.msra.mxu1 %v2883_v9  ;;  %v3404_v9 = vsub.s32 1, %v100_v26 }
 0x25d   :  { %1673 = vmatprep.subr.bf16.mxu1 %v2888_v23  ;;  %v1440_v23 = vrot.slane %v1142_v8, %v3399_v21 }
 0x25e   :  { %v1444_v25 = vrot.slane %v1142_v8, %v3404_v9 }
 0x260   :  { %1674 = vmatpush1.bf16.msra.mxu1 %v2886_v22  ;;  %v1143_v22 = vld [vmem:[%s3453_s4] sm:$0x3] }
 0x261   :  { %1927 = vmatprep.subr.bf16.mxu1 %v2891_v24 }
 0x2f6   :  { %v1371_v29 = vpop.f32.mrb[0].mxu1 }
 0x2f7   :  { %v1373_v30 = vpop.f32.mrb[1].mxu1  ;;  %v1380_v32 = vmul.f32 %v3393_v28, %v1371_v29 }
 0x2f8   :  { %v1375_v31 = vpop.f32.mrb[2].mxu1  ;;  %v1381_v35 = vmul.f32 %v3393_v28, %v1373_v30 }
 0x2f9   :  { %v1382_v33 = vmul.f32 0.0, %v1375_v31  ;;  %v1377_v34 = vpop.f32.mrb[3].mxu1 }
 0x2fa   :  { %v1383_v36 = vmul.f32 0.0, %v1377_v34 }
 0x2fb   :  { %v1384_v37 = vadd.f32 %v1382_v33, %v1380_v32 }
 0x2fc   :  { %v1391_v38 = vadd.f32 %v1383_v36, %v1381_v35 }
 0x2fd   :  { %v1385_v39 = vrot.slane %v1384_v37, 4 }
 0x2fe   :  { %v1392_v40 = vrot.slane %v1391_v38, 4 }
 0x2ff   :  { %v1386_v41 = vadd.f32 %v1385_v39, %v1384_v37 }
 0x300   :  { %v1393_v42 = vadd.f32 %v1392_v40, %v1391_v38 }
 0x301   :  { %v1387_v43 = vrot.slane %v1386_v41, 2 }
 0x302   :  { %v1394_v44 = vrot.slane %v1393_v42, 2 }
 0x303   :  { %v1388_v45 = vadd.f32 %v1387_v43, %v1386_v41 }
 0x304   :  { %v1395_v46 = vadd.f32 %v1394_v44, %v1393_v42 }
 0x305   :  { %v1389_v47 = vrot.slane %v1388_v45, 1 }
 0x306   :  { %v1396_v48 = vrot.slane %v1395_v46, 1 }
 0x307   :  { %v1390_v49 = vadd.f32 %v1389_v47, %v1388_v45 }
 0x308   :  { %v1397_v50 = vadd.f32 %v1396_v48, %v1395_v46  ;;  %v2889_v48 = vld [vmem:[#allocation6] ss:$8 sps:$4 sm:$0xff]  }
 0x309   :  { %v1398_v51 = vmul.f32 0.5, %v1390_v49  ;;  %v2894_v49 = vld [vmem:[#allocation6 + $0x14] ss:$8 sps:$4 sm:$0xff]  }
 0x30a   :  { %v1399_v52 = vmul.f32 0.5, %v1397_v50  ;;  %v2892_v50 = vld [vmem:[#allocation6 + $0x10] ss:$8 sps:$4 sm:$0xff]  }
 0x30b   :  { %v1400_v53 = vsub.f32 %v1371_v29, %v1398_v51  ;;  %v1402_v54 = vsub.f32 %v1375_v31, %v1398_v51  ;;  %v1455_v31 = vrot.slane %v1143_v22, %v3399_v21  ;;  %v2897_v51 = vld [vmem:[#allocation6 + $0x24] ss:$8 sps:$4 sm:$0xff]  }
 0x30c   :  { %v1401_v55 = vsub.f32 %v1373_v30, %v1399_v52  ;;  %v1403_v56 = vsub.f32 %v1377_v34, %v1399_v52  ;;  %v1459_v34 = vrot.slane %v1143_v22, %v3404_v9  ;;  %v2895_v52 = vld [vmem:[#allocation6 + $0x20] ss:$8 sps:$4 sm:$0xff]  }
 0x30d   :  { %v1404_v57 = vmul.f32 %v1400_v53, %v1400_v53  ;;  %v1406_v58 = vmul.f32 %v1402_v54, %v1402_v54 }
 0x30e   :  { %v1405_v59 = vmul.f32 %v1401_v55, %v1401_v55  ;;  %v1407_v60 = vmul.f32 %v1403_v56, %v1403_v56 }
 0x30f   :  { %v1408_v61 = vmul.f32 %v3393_v28, %v1404_v57  ;;  %v1410_v62 = vmul.f32 0.0, %v1406_v58  ;;  %v2906_v57 = vld [vmem:[#allocation6 + $0x54] ss:$8 sps:$4 sm:$0xff]   ;;  %v2904_v58 = vld [vmem:[#allocation6 + $0x50] ss:$8 sps:$4 sm:$0xff]  }
 0x310   :  { %v1409_v63 = vmul.f32 %v3393_v28, %v1405_v59  ;;  %v1411_v0 = vmul.f32 0.0, %v1407_v60  ;;  %v2909_v59 = vld [vmem:[#allocation6 + $0x64] ss:$8 sps:$4 sm:$0xff]   ;;  %v2907_v60 = vld [vmem:[#allocation6 + $0x60] ss:$8 sps:$4 sm:$0xff]  }
 0x311   :  { %v1412_v1 = vadd.f32 %v1410_v62, %v1408_v61  ;;  %v2912_v61 = vld [vmem:[#allocation6 + $0x74] ss:$8 sps:$4 sm:$0xff]   ;;  %v2910_v62 = vld [vmem:[#allocation6 + $0x70] ss:$8 sps:$4 sm:$0xff]  }
 0x312   :  { %v1419_v2 = vadd.f32 %v1411_v0, %v1409_v63  ;;  %v2915_v63 = vld [vmem:[#allocation6 + $0x84] ss:$8 sps:$4 sm:$0xff]   ;;  %v2913_v0 = vld [vmem:[#allocation6 + $0x80] ss:$8 sps:$4 sm:$0xff]  }
 0x313   :  { %v1413_v3 = vrot.slane %v1412_v1, 4 }
 0x314   :  { %v1420_v4 = vrot.slane %v1419_v2, 4 }
 0x315   :  { %v1414_v5 = vadd.f32 %v1413_v3, %v1412_v1  ;;  %v2918_v1 = vld [vmem:[#allocation6 + $0x94] ss:$8 sps:$4 sm:$0xff]   ;;  %v2921_v3 = vld [vmem:[#allocation6 + $0xa4] ss:$8 sps:$4 sm:$0xff]  }
 0x316   :  { %v1421_v6 = vadd.f32 %v1420_v4, %v1419_v2  ;;  %v2916_v2 = vld [vmem:[#allocation6 + $0x90] ss:$8 sps:$4 sm:$0xff]   ;;  %v2919_v4 = vld [vmem:[#allocation6 + $0xa0] ss:$8 sps:$4 sm:$0xff]  }
 0x317   :  { %v1415_v7 = vrot.slane %v1414_v5, 2 }
 0x318   :  { %v1422_v10 = vrot.slane %v1421_v6, 2 }
 0x319   :  { %v1416_v11 = vadd.f32 %v1415_v7, %v1414_v5  ;;  %v2924_v5 = vld [vmem:[#allocation6 + $0xb4] ss:$8 sps:$4 sm:$0xff]   ;;  %v2927_v7 = vld [vmem:[#allocation6 + $0xc4] ss:$8 sps:$4 sm:$0xff]  }
 0x31a   :  { %v1423_v12 = vadd.f32 %v1422_v10, %v1421_v6  ;;  %v2922_v6 = vld [vmem:[#allocation6 + $0xb0] ss:$8 sps:$4 sm:$0xff]   ;;  %v2925_v10 = vld [vmem:[#allocation6 + $0xc0] ss:$8 sps:$4 sm:$0xff]  }
 0x31b   :  { %v1417_v13 = vrot.slane %v1416_v11, 1 }
 0x31c   :  { %v1424_v14 = vrot.slane %v1423_v12, 1 }
 0x31d   :  { %v1418_v15 = vadd.f32 %v1417_v13, %v1416_v11  ;;  %v2930_v11 = vld [vmem:[#allocation6 + $0xd4] ss:$8 sps:$4 sm:$0xff]   ;;  %v2933_v13 = vld [vmem:[#allocation6 + $0xe4] ss:$8 sps:$4 sm:$0xff]  }
 0x31e   :  { %v1425_v16 = vadd.f32 %v1424_v14, %v1423_v12  ;;  %v2928_v12 = vld [vmem:[#allocation6 + $0xd0] ss:$8 sps:$4 sm:$0xff]   ;;  %v2931_v14 = vld [vmem:[#allocation6 + $0xe0] ss:$8 sps:$4 sm:$0xff]  }
 0x31f   :  { %v1426_v17 = vmul.f32 0.5, %v1418_v15  ;;  %v2936_v15 = vld [vmem:[#allocation6 + $0xf4] ss:$8 sps:$4 sm:$0xff]  }
 0x320   :  { %v1427_v18 = vmul.f32 0.5, %v1425_v16  ;;  %v2934_v16 = vld [vmem:[#allocation6 + $0xf0] ss:$8 sps:$4 sm:$0xff]  }
 0x321   :  { %v1428_v19 = vadd.f32 1e-05, %v1426_v17  ;;  %v1176_v17 = vld [vmem:[%s3455_s6] sm:$0x3] }
 0x322   :  { %v1429_v20 = vadd.f32 1e-05, %v1427_v18  ;;  %v1476_v18 = vrot.slane %v1176_v17, %v3399_v21 }
 0x323   :  { %2985 = vrsqrt.f32 %v1428_v19  ;;  %v1480_v19 = vrot.slane %v1176_v17, %v3404_v9 }
 0x324   :  { %2987 = vrsqrt.f32 %v1429_v20 }
 0x32d   :  { %v2986_v24 = vpop.eup %2985 }
 0x32e   :  { %v2988_v27 = vpop.eup %2987  ;;  %v1432_v29 = vmul.f32 %v2986_v24, %v1400_v53  ;;  %v1434_v30 = vmul.f32 %v2986_v24, %v1402_v54  ;;  %v2900_v53 = vld [vmem:[#allocation6 + $0x34] ss:$8 sps:$4 sm:$0xff]   ;;  %v2898_v54 = vld [vmem:[#allocation6 + $0x30] ss:$8 sps:$4 sm:$0xff]  }
 0x32f   :  { %v1433_v32 = vmul.f32 %v2988_v27, %v1401_v55  ;;  %v1435_v33 = vmul.f32 %v2988_v27, %v1403_v56  ;;  %v2903_v55 = vld [vmem:[#allocation6 + $0x44] ss:$8 sps:$4 sm:$0xff]   ;;  %v2901_v56 = vld [vmem:[#allocation6 + $0x40] ss:$8 sps:$4 sm:$0xff]  }
 0x330   :  { %v1447_v26 = vmul.f32 %v1440_v23, %v1432_v29  ;;  %v1449_v35 = vmul.f32 %v1440_v23, %v1434_v30 }
 0x331   :  { %v1450_v36 = vmul.f32 %v1444_v25, %v1435_v33  ;;  %v1448_v37 = vmul.f32 %v1444_v25, %v1433_v32 }
 0x332   :  { %v1464_v38 = vadd.f32 %v1455_v31, %v1449_v35  ;;  %v1462_v39 = vadd.f32 %v1455_v31, %v1447_v26  ;;  %v2937_v26 = vld [vmem:[#allocation7] ss:$8 sps:$4 sm:$0xff]   ;;  %v2942_v35 = vld [vmem:[#allocation7 + $0x14] ss:$8 sps:$4 sm:$0xff]  }
 0x333   :  { %v1463_v40 = vadd.f32 %v1459_v34, %v1448_v37  ;;  %v1465_v41 = vadd.f32 %v1459_v34, %v1450_v36  ;;  %v2939_v34 = vld [vmem:[#allocation7 + $0x4] ss:$8 sps:$4 sm:$0xff]   ;;  %v2940_v36 = vld [vmem:[#allocation7 + $0x10] ss:$8 sps:$4 sm:$0xff]  }
 0x334   :  { %v1468_v42 = vmax.f32 %v1464_v38, 0.0  ;;  %v1466_v43 = vmax.f32 %v1462_v39, 0.0  ;;  %v2945_v37 = vld [vmem:[#allocation7 + $0x24] ss:$8 sps:$4 sm:$0xff]   ;;  %v2943_v38 = vld [vmem:[#allocation7 + $0x20] ss:$8 sps:$4 sm:$0xff]  }
 0x335   :  { %v1467_v44 = vmax.f32 %v1463_v40, 0.0  ;;  %v1469_v45 = vmax.f32 %v1465_v41, 0.0  ;;  %v2948_v39 = vld [vmem:[#allocation7 + $0x34] ss:$8 sps:$4 sm:$0xff]   ;;  %v2946_v40 = vld [vmem:[#allocation7 + $0x30] ss:$8 sps:$4 sm:$0xff]  }
 0x336   :  { %v1470_v46 = vpack.c.bf16 %v1468_v42, %v1466_v43  ;;  %v2951_v41 = vld [vmem:[#allocation7 + $0x44] ss:$8 sps:$4 sm:$0xff]   ;;  %v2949_v42 = vld [vmem:[#allocation7 + $0x40] ss:$8 sps:$4 sm:$0xff]   ;;  %v2954_v43 = vld [vmem:[#allocation7 + $0x54] ss:$8 sps:$4 sm:$0xff]  }
 0x337   :  { %v1471_v47 = vpack.c.bf16 %v1469_v45, %v1467_v44  ;;  %v2952_v44 = vld [vmem:[#allocation7 + $0x50] ss:$8 sps:$4 sm:$0xff]   ;;  %v2957_v45 = vld [vmem:[#allocation7 + $0x64] ss:$8 sps:$4 sm:$0xff]  }
 0x339   :  { %1675 = vmatprep.mubr.bf16.mxu1 %v1471_v47  ;;  %v2960_v47 = vld [vmem:[#allocation7 + $0x74] ss:$8 sps:$4 sm:$0xff]  }
 0x33a   :  { %1676 = vmatmul.mubr.bf16.vlgmr.msra.gmra.mrb[4].mxu1 %v1470_v46  ;;  %v2955_v46 = vld [vmem:[#allocation7 + $0x60] ss:$8 sps:$4 sm:$0xff]  }
 0x33b   :  { %1928 = vmatpush1.bf16.msra.mxu1 %v2889_v48  ;;  %v2958_v48 = vld [vmem:[#allocation7 + $0x70] ss:$8 sps:$4 sm:$0xff]  }
 0x33c   :  { %1929 = vmatprep.subr.bf16.mxu1 %v2894_v49  ;;  %v2963_v49 = vld [vmem:[#allocation7 + $0x84] ss:$8 sps:$4 sm:$0xff]  }
 0x33f   :  { %1930 = vmatpush1.bf16.msra.mxu1 %v2892_v50  ;;  %v2961_v50 = vld [vmem:[#allocation7 + $0x80] ss:$8 sps:$4 sm:$0xff]  }
 0x340   :  { %1931 = vmatprep.subr.bf16.mxu1 %v2897_v51  ;;  %v2966_v51 = vld [vmem:[#allocation7 + $0x94] ss:$8 sps:$4 sm:$0xff]  }
 0x343   :  { %1932 = vmatpush1.bf16.msra.mxu1 %v2895_v52  ;;  %v2964_v52 = vld [vmem:[#allocation7 + $0x90] ss:$8 sps:$4 sm:$0xff]  }
 0x344   :  { %1933 = vmatprep.subr.bf16.mxu1 %v2900_v53  ;;  %v2969_v53 = vld [vmem:[#allocation7 + $0xa4] ss:$8 sps:$4 sm:$0xff]  }
 0x347   :  { %1934 = vmatpush1.bf16.msra.mxu1 %v2898_v54  ;;  %v2967_v54 = vld [vmem:[#allocation7 + $0xa0] ss:$8 sps:$4 sm:$0xff]  }
 0x348   :  { %1935 = vmatprep.subr.bf16.mxu1 %v2903_v55  ;;  %v2972_v55 = vld [vmem:[#allocation7 + $0xb4] ss:$8 sps:$4 sm:$0xff]  }
 0x34b   :  { %1936 = vmatpush1.bf16.msra.mxu1 %v2901_v56  ;;  %v2970_v56 = vld [vmem:[#allocation7 + $0xb0] ss:$8 sps:$4 sm:$0xff]  }
 0x34c   :  { %1937 = vmatprep.subr.bf16.mxu1 %v2906_v57  ;;  %v2975_v57 = vld [vmem:[#allocation7 + $0xc4] ss:$8 sps:$4 sm:$0xff]  }
 0x34f   :  { %1938 = vmatpush1.bf16.msra.mxu1 %v2904_v58  ;;  %v2973_v58 = vld [vmem:[#allocation7 + $0xc0] ss:$8 sps:$4 sm:$0xff]  }
 0x350   :  { %1939 = vmatprep.subr.bf16.mxu1 %v2909_v59  ;;  %v2978_v59 = vld [vmem:[#allocation7 + $0xd4] ss:$8 sps:$4 sm:$0xff]  }
 0x353   :  { %1940 = vmatpush1.bf16.msra.mxu1 %v2907_v60  ;;  %v2976_v60 = vld [vmem:[#allocation7 + $0xd0] ss:$8 sps:$4 sm:$0xff]  }
 0x354   :  { %1941 = vmatprep.subr.bf16.mxu1 %v2912_v61  ;;  %v2981_v61 = vld [vmem:[#allocation7 + $0xe4] ss:$8 sps:$4 sm:$0xff]  }
 0x357   :  { %1942 = vmatpush1.bf16.msra.mxu1 %v2910_v62  ;;  %v2979_v62 = vld [vmem:[#allocation7 + $0xe0] ss:$8 sps:$4 sm:$0xff]  }
 0x358   :  { %1943 = vmatprep.subr.bf16.mxu1 %v2915_v63  ;;  %v2982_v63 = vld [vmem:[#allocation7 + $0xf0] ss:$8 sps:$4 sm:$0xff]  }
 0x35b   :  { %1944 = vmatpush1.bf16.msra.mxu1 %v2913_v0  ;;  %v2984_v0 = vld [vmem:[#allocation7 + $0xf4] ss:$8 sps:$4 sm:$0xff]  }
 0x35c   :  { %1945 = vmatprep.subr.bf16.mxu1 %v2918_v1 }
 0x35f   :  { %1946 = vmatpush1.bf16.msra.mxu1 %v2916_v2 }
 0x360   :  { %1947 = vmatprep.subr.bf16.mxu1 %v2921_v3 }
 0x363   :  { %1948 = vmatpush1.bf16.msra.mxu1 %v2919_v4 }
 0x364   :  { %1949 = vmatprep.subr.bf16.mxu1 %v2924_v5 }
 0x367   :  { %1950 = vmatpush1.bf16.msra.mxu1 %v2922_v6 }
 0x368   :  { %1951 = vmatprep.subr.bf16.mxu1 %v2927_v7 }
 0x36b   :  { %1952 = vmatpush1.bf16.msra.mxu1 %v2925_v10 }
 0x36c   :  { %1953 = vmatprep.subr.bf16.mxu1 %v2930_v11 }
 0x36f   :  { %1954 = vmatpush1.bf16.msra.mxu1 %v2928_v12 }
 0x370   :  { %1955 = vmatprep.subr.bf16.mxu1 %v2933_v13 }
 0x373   :  { %1956 = vmatpush1.bf16.msra.mxu1 %v2931_v14 }
 0x374   :  { %1957 = vmatprep.subr.bf16.mxu1 %v2936_v15 }
 0x377   :  { %1958 = vmatpush1.bf16.msra.mxu1 %v2934_v16 }
 0x378   :  { %2233 = vmatprep.subr.bf16.mxu1 %v2939_v34 }
 0x40d   :  { %v1677_v20 = vpop.f32.mrb[4].mxu1 }
 0x40e   :  { %v1678_v8 = vadd.f32 %v1677_v20, %v1476_v18  ;;  %v1679_v22 = vpop.f32.mrb[5].mxu1 }
 0x40f   :  { %v1680_v23 = vadd.f32 %v1679_v22, %v1480_v19  ;;  %v1681_v24 = vpop.f32.mrb[6].mxu1 }
 0x410   :  { %v1682_v25 = vadd.f32 %v1681_v24, %v1476_v18  ;;  %v1683_v27 = vpop.f32.mrb[7].mxu1 }
 0x411   :  { %v2578_v29 = vpack.c.bf16 %v1680_v23, %v1678_v8  ;;  %v1684_v30 = vadd.f32 %v1683_v27, %v1480_v19 }
 0x412   :  { %v1686_v31 = vpack.c.bf16 %v1682_v25, %v1678_v8 }
 0x413   :  { %1698 = vst [vmem:[%s3462_s13] sm:$0xff] %v2578_v29  ;;  %v1687_v32 = vpack.c.bf16 %v1684_v30, %v1680_v23  ;;  %v2579_v33 = vpack.c.bf16 %v1684_v30, %v1682_v25 }
 0x415   :  { %1699 = vst [vmem:[%s3462_s13 + $0x8] sm:$0xff] %v2579_v33  ;;  %1959 = vmatprep.mubr.bf16.mxu1 %v1687_v32 }
 0x416   :  { %1960 = vmatmul.mubr.bf16.vlgmr.msra.gmra.mrb[8].mxu1 %v1686_v31 }
 0x417   :  { %2234 = vmatpush1.bf16.msra.mxu1 %v2937_v26 }
 0x418   :  { %2235 = vmatprep.subr.bf16.mxu1 %v2942_v35 }
 0x41b   :  { %2236 = vmatpush1.bf16.msra.mxu1 %v2940_v36 }
 0x41c   :  { %2237 = vmatprep.subr.bf16.mxu1 %v2945_v37 }
 0x41f   :  { %2238 = vmatpush1.bf16.msra.mxu1 %v2943_v38 }
 0x420   :  { %2239 = vmatprep.subr.bf16.mxu1 %v2948_v39 }
 0x423   :  { %2240 = vmatpush1.bf16.msra.mxu1 %v2946_v40 }
 0x424   :  { %2241 = vmatprep.subr.bf16.mxu1 %v2951_v41 }
 0x427   :  { %2242 = vmatpush1.bf16.msra.mxu1 %v2949_v42 }
 0x428   :  { %2243 = vmatprep.subr.bf16.mxu1 %v2954_v43 }
 0x42b   :  { %2244 = vmatpush1.bf16.msra.mxu1 %v2952_v44 }
 0x42c   :  { %2245 = vmatprep.subr.bf16.mxu1 %v2957_v45 }
 0x42f   :  { %2246 = vmatpush1.bf16.msra.mxu1 %v2955_v46 }
 0x430   :  { %2247 = vmatprep.subr.bf16.mxu1 %v2960_v47 }
 0x433   :  { %2248 = vmatpush1.bf16.msra.mxu1 %v2958_v48 }
 0x434   :  { %2249 = vmatprep.subr.bf16.mxu1 %v2963_v49 }
 0x437   :  { %2250 = vmatpush1.bf16.msra.mxu1 %v2961_v50 }
 0x438   :  { %2251 = vmatprep.subr.bf16.mxu1 %v2966_v51 }
 0x43b   :  { %2252 = vmatpush1.bf16.msra.mxu1 %v2964_v52 }
 0x43c   :  { %2253 = vmatprep.subr.bf16.mxu1 %v2969_v53 }
 0x43f   :  { %2254 = vmatpush1.bf16.msra.mxu1 %v2967_v54 }
 0x440   :  { %2255 = vmatprep.subr.bf16.mxu1 %v2972_v55 }
 0x443   :  { %2256 = vmatpush1.bf16.msra.mxu1 %v2970_v56 }
 0x444   :  { %2257 = vmatprep.subr.bf16.mxu1 %v2975_v57 }
 0x447   :  { %2258 = vmatpush1.bf16.msra.mxu1 %v2973_v58  ;;  %v1733_v58 = vld [vmem:[%s3458_s9] sm:$0x3] }
 0x448   :  { %2259 = vmatprep.subr.bf16.mxu1 %v2978_v59 }
 0x44b   :  { %2260 = vmatpush1.bf16.msra.mxu1 %v2976_v60 }
 0x44c   :  { %2261 = vmatprep.subr.bf16.mxu1 %v2981_v61 }
 0x44f   :  { %2262 = vmatpush1.bf16.msra.mxu1 %v2979_v62 }
 0x450   :  { %2263 = vmatprep.subr.bf16.mxu1 %v2984_v0 }
 0x453   :  { %2264 = vmatpush1.bf16.msra.mxu1 %v2982_v63 }
 0x4e9   :  { %v1961_v1 = vpop.f32.mrb[8].mxu1 }
 0x4ea   :  { %v1963_v2 = vpop.f32.mrb[9].mxu1  ;;  %v1970_v4 = vmul.f32 %v3393_v28, %v1961_v1 }
 0x4eb   :  { %v1965_v3 = vpop.f32.mrb[10].mxu1  ;;  %v1971_v7 = vmul.f32 %v3393_v28, %v1963_v2 }
 0x4ec   :  { %v1972_v5 = vmul.f32 0.0, %v1965_v3  ;;  %v1967_v6 = vpop.f32.mrb[11].mxu1 }
 0x4ed   :  { %v1973_v10 = vmul.f32 0.0, %v1967_v6 }
 0x4ee   :  { %v1974_v11 = vadd.f32 %v1972_v5, %v1970_v4  ;;  %v2049_v4 = vrot.slane %v1733_v58, %v3404_v9 }
 0x4ef   :  { %v1981_v12 = vadd.f32 %v1973_v10, %v1971_v7 }
 0x4f0   :  { %v1975_v13 = vrot.slane %v1974_v11, 4 }
 0x4f1   :  { %v1982_v14 = vrot.slane %v1981_v12, 4 }
 0x4f2   :  { %v1976_v15 = vadd.f32 %v1975_v13, %v1974_v11 }
 0x4f3   :  { %v1983_v16 = vadd.f32 %v1982_v14, %v1981_v12 }
 0x4f4   :  { %v1977_v17 = vrot.slane %v1976_v15, 2 }
 0x4f5   :  { %v1984_v18 = vrot.slane %v1983_v16, 2 }
 0x4f6   :  { %v1978_v19 = vadd.f32 %v1977_v17, %v1976_v15 }
 0x4f7   :  { %v1985_v20 = vadd.f32 %v1984_v18, %v1983_v16 }
 0x4f8   :  { %v1979_v8 = vrot.slane %v1978_v19, 1 }
 0x4f9   :  { %v1986_v22 = vrot.slane %v1985_v20, 1 }
 0x4fa   :  { %v1980_v23 = vadd.f32 %v1979_v8, %v1978_v19  ;;  %v1766_v8 = vld [vmem:[%s3460_s11] sm:$0x3] }
 0x4fb   :  { %v1987_v24 = vadd.f32 %v1986_v22, %v1985_v20  ;;  %v2066_v22 = vrot.slane %v1766_v8, %v3399_v21 }
 0x4fc   :  { %v1988_v25 = vmul.f32 0.5, %v1980_v23  ;;  %v2070_v23 = vrot.slane %v1766_v8, %v3404_v9 }
 0x4fd   :  { %v1989_v27 = vmul.f32 0.5, %v1987_v24 }
 0x4fe   :  { %v1990_v29 = vsub.f32 %v1961_v1, %v1988_v25  ;;  %v1992_v30 = vsub.f32 %v1965_v3, %v1988_v25  ;;  %v2045_v1 = vrot.slane %v1733_v58, %v3399_v21 }
 0x4ff   :  { %v1991_v31 = vsub.f32 %v1963_v2, %v1989_v27  ;;  %v1993_v32 = vsub.f32 %v1967_v6, %v1989_v27 }
 0x500   :  { %v1994_v33 = vmul.f32 %v1990_v29, %v1990_v29  ;;  %v1996_v34 = vmul.f32 %v1992_v30, %v1992_v30 }
 0x501   :  { %v1995_v26 = vmul.f32 %v1991_v31, %v1991_v31  ;;  %v1997_v35 = vmul.f32 %v1993_v32, %v1993_v32 }
 0x502   :  { %v1998_v36 = vmul.f32 %v3393_v28, %v1994_v33  ;;  %v2000_v37 = vmul.f32 0.0, %v1996_v34 }
 0x503   :  { %v1999_v38 = vmul.f32 %v3393_v28, %v1995_v26  ;;  %v2001_v39 = vmul.f32 0.0, %v1997_v35  ;;  %v1732_v28 = vld [vmem:[%s3457_s8] sm:$0x3] }
 0x504   :  { %v2002_v40 = vadd.f32 %v2000_v37, %v1998_v36  ;;  %v2030_v59 = vrot.slane %v1732_v28, %v3399_v21  ;;  %v2034_v61 = vrot.slane %v1732_v28, %v3404_v9 }
 0x505   :  { %v2009_v41 = vadd.f32 %v2001_v39, %v1999_v38 }
 0x506   :  { %v2003_v42 = vrot.slane %v2002_v40, 4 }
 0x507   :  { %v2010_v43 = vrot.slane %v2009_v41, 4 }
 0x508   :  { %v2004_v44 = vadd.f32 %v2003_v42, %v2002_v40 }
 0x509   :  { %v2011_v45 = vadd.f32 %v2010_v43, %v2009_v41 }
 0x50a   :  { %v2005_v46 = vrot.slane %v2004_v44, 2 }
 0x50b   :  { %v2012_v47 = vrot.slane %v2011_v45, 2 }
 0x50c   :  { %v2006_v48 = vadd.f32 %v2005_v46, %v2004_v44 }
 0x50d   :  { %v2013_v49 = vadd.f32 %v2012_v47, %v2011_v45 }
 0x50e   :  { %v2007_v50 = vrot.slane %v2006_v48, 1 }
 0x50f   :  { %v2014_v51 = vrot.slane %v2013_v49, 1 }
 0x510   :  { %v2008_v52 = vadd.f32 %v2007_v50, %v2006_v48 }
 0x511   :  { %v2015_v53 = vadd.f32 %v2014_v51, %v2013_v49 }
 0x512   :  { %v2016_v54 = vmul.f32 0.5, %v2008_v52 }
 0x513   :  { %v2017_v55 = vmul.f32 0.5, %v2015_v53 }
 0x514   :  { %v2018_v56 = vadd.f32 1e-05, %v2016_v54 }
 0x515   :  { %v2019_v57 = vadd.f32 1e-05, %v2017_v55 }
 0x516   :  { %2989 = vrsqrt.f32 %v2018_v56 }
 0x517   :  { %2991 = vrsqrt.f32 %v2019_v57 }
 0x520   :  { %v2990_v60 = vpop.eup %2989 }
 0x521   :  { %v2992_v62 = vpop.eup %2991  ;;  %v2022_v63 = vmul.f32 %v2990_v60, %v1990_v29  ;;  %v2024_v0 = vmul.f32 %v2990_v60, %v1992_v30 }
 0x522   :  { %v2023_v2 = vmul.f32 %v2992_v62, %v1991_v31  ;;  %v2025_v3 = vmul.f32 %v2992_v62, %v1993_v32 }
 0x523   :  { %v2037_v5 = vmul.f32 %v2030_v59, %v2022_v63  ;;  %v2039_v6 = vmul.f32 %v2030_v59, %v2024_v0 }
 0x524   :  { %v2040_v7 = vmul.f32 %v2034_v61, %v2025_v3  ;;  %v2038_v10 = vmul.f32 %v2034_v61, %v2023_v2 }
 0x525   :  { %v2054_v11 = vadd.f32 %v2045_v1, %v2039_v6  ;;  %v2052_v12 = vadd.f32 %v2045_v1, %v2037_v5 }
 0x526   :  { %v2053_v13 = vadd.f32 %v2049_v4, %v2038_v10  ;;  %v2055_v14 = vadd.f32 %v2049_v4, %v2040_v7 }
 0x527   :  { %v2058_v15 = vmax.f32 %v2054_v11, 0.0  ;;  %v2056_v16 = vmax.f32 %v2052_v12, 0.0 }
 0x528   :  { %v2057_v17 = vmax.f32 %v2053_v13, 0.0  ;;  %v2059_v18 = vmax.f32 %v2055_v14, 0.0 }
 0x529   :  { %v2060_v19 = vpack.c.bf16 %v2058_v15, %v2056_v16 }
 0x52a   :  { %v2061_v20 = vpack.c.bf16 %v2059_v18, %v2057_v17 }
 0x52c   :  { %2265 = vmatprep.mubr.bf16.mxu1 %v2061_v20 }
 0x52d   :  { %2266 = vmatmul.mubr.bf16.vlgmr.msra.gmra.mrb[12].mxu1 %v2060_v19 }
 0x600   :  { %v2267_v24 = vpop.f32.mrb[12].mxu1 }
 0x601   :  { %v2268_v25 = vadd.f32 %v2267_v24, %v2066_v22  ;;  %v2269_v27 = vpop.f32.mrb[13].mxu1 }
 0x602   :  { %v2270_v29 = vadd.f32 %v2269_v27, %v2070_v23  ;;  %v2271_v30 = vpop.f32.mrb[14].mxu1 }
 0x603   :  { %v2272_v31 = vadd.f32 %v2271_v30, %v2066_v22  ;;  %v2273_v32 = vpop.f32.mrb[15].mxu1 }
 0x604   :  { %v2580_v33 = vpack.c.bf16 %v2270_v29, %v2268_v25  ;;  %v2274_v34 = vadd.f32 %v2273_v32, %v2070_v23 }
 0x606   :  { %2288 = vst [vmem:[%s3463_s14] sm:$0xff] %v2580_v33  ;;  %v2581_v26 = vpack.c.bf16 %v2274_v34, %v2272_v31 }
 0x608   :  { %2289 = vst [vmem:[%s3463_s14 + $0x8] sm:$0xff] %v2581_v26 }
 0x609   :  { %2302 = vsyncpa [#allocation3], 1 }
 0x60a   :  { %2303 = vsyncpa [#allocation5], 1 }
 0x60b   :  { %2304 = vsyncpa [#allocation8], 1 }

</bundles_post_ra>
